<compile_context>
chip_gen: v5e
topology: v5e:2x2
jax: 0.10.0
libtpu: 0.0.40
codegen_flags: <defaults>
</compile_context>

<pallas_src>
from functools import partial

import jax
import jax.numpy as jnp
from jax import lax
from jax.experimental import pallas as pl
from jax.experimental.pallas import tpu as pltpu


def lstm_prediction_kernel(x_ref,      # SMEM (B, T)        raw scalar signal (input_size == 1)
                           slab_ref,   # VMEM (8 + 4H, 4H)  packed weights/biases (see prepare_params)
                           out_ref,    # VMEM (B, O)
                           xp_ref):    # VMEM scratch (T, B, 4H): fused layer-0 input projection
    B, T = x_ref.shape
    G = slab_ref.shape[1]              # 4H
    H = G // 4
    O = out_ref.shape[1]

    # --- static views into the single packed slab (one DMA for all parameters) ---
    wih0 = slab_ref[0:1, :]                    # (1, 4H)  W_ih(layer0)^T  (input_size == 1)
    b0   = slab_ref[1:2, :]                    # (1, 4H)  b_ih0 + b_hh0
    b1   = slab_ref[2:3, :]                    # (1, 4H)  b_ih1 + b_hh1
    bfc  = slab_ref[3:4, :]                    # (1, 4H)  fc bias, zero-padded past O lanes
    whh0 = slab_ref[8:8 + H, :]                # (H, 4H)  W_hh(layer0)^T
    wih1 = slab_ref[8 + H:8 + 2 * H, :]        # (H, 4H)  W_ih(layer1)^T
    whh1 = slab_ref[8 + 2 * H:8 + 3 * H, :]    # (H, 4H)  W_hh(layer1)^T
    wfc  = slab_ref[8 + 3 * H:8 + 4 * H, :]    # (H, 4H)  fc weight^T, zero-padded past O lanes

    # Hoisted broadcast (JAX does not CSE broadcast_in_dim across the unrolled steps).
    b1b = jnp.broadcast_to(b1, (B, G))

    # --- fused layer-0 input projection: x[b, t] * wih0_row + b0 -> (T, B, 4H) scratch ---
    # One-time prologue depending only on the inputs, so it sits off the recurrence chain.
    for t in range(T):                                           # T, B are static and tiny
        rows = [x_ref[b, t] * wih0 + b0 for b in range(B)]       # scalar-broadcast multiply, (1, 4H) each
        xp_ref[t] = jnp.concatenate(rows, axis=0)                # (B, 4H)

    def sigmoid(v):
        # sigmoid(x) = 0.5*(tanh(x/2)+1): one EUP push, avoids an exp + divide on the chain.
        return 0.5 * (jnp.tanh(0.5 * v) + 1.0)

    def cell_update(gates, c):
        # Full-vreg activations (one tanh-sigmoid + one tanh on (B, 4H)), then align the
        # f/g/o blocks to lane 0 with XLU rolls.  Lane layout along 4H: [i | f | g | o].
        sg = sigmoid(gates)
        th = jnp.tanh(gates)
        i = sg[:, :H]
        f = pltpu.roll(sg, 3 * H, 1)[:, :H]    # block at offset  H -> offset 0
        g = pltpu.roll(th, 2 * H, 1)[:, :H]    # block at offset 2H -> offset 0
        o = pltpu.roll(sg, 1 * H, 1)[:, :H]    # block at offset 3H -> offset 0
        c_new = f * c + i * g
        h_new = o * jnp.tanh(c_new)
        return h_new, c_new

    def body(t, carry):
        h1, c1, h2, c2 = carry
        # Layer-1 hidden-side product: depends only on the previous step's h2, so it can
        # overlap layer-0 compute instead of waiting for h1_new.  (On v7x the compiler may
        # additionally keep both layer-1 partial products in the same MRB accumulator.)
        p1 = jnp.dot(h2, whh1, preferred_element_type=jnp.float32) + b1b
        # Layer 0: input projection already in scratch; only the recurrent matmul remains.
        g0 = xp_ref[t] + jnp.dot(h1, whh0, preferred_element_type=jnp.float32)
        h1n, c1n = cell_update(g0, c1)
        # Layer 1.
        g1 = jnp.dot(h1n, wih1, preferred_element_type=jnp.float32) + p1
        h2n, c2n = cell_update(g1, c2)
        return (h1n, c1n, h2n, c2n)

    z = jnp.zeros((B, H), jnp.float32)
    # Fully unrolled recurrence: one basic block so the LLO scheduler interleaves the two
    # layers' MXU/EUP chains across adjacent timesteps.
    _, _, h2, _ = lax.fori_loop(0, T, body, (z, z, z, z), unroll=True)

    # Last-timestep hidden state of the top layer -> fc -> sigmoid.
    logits = jnp.dot(h2, wfc, preferred_element_type=jnp.float32) + bfc   # (B, 4H); lanes >= O are 0
    out_ref[...] = sigmoid(logits[:, :O])


def init_params(key, input_size, hidden_size, output_size):
    """Deterministic init mimicking PyTorch default U(-1/sqrt(H), 1/sqrt(H))."""
    k = 1.0 / jnp.sqrt(jnp.float32(hidden_size))
    keys = jax.random.split(key, 10)
    u = lambda kk, shape: jax.random.uniform(kk, shape, jnp.float32, -k, k)
    H, I, O = hidden_size, input_size, output_size
    return {
        # layer 0 of nn.LSTM
        "w_ih0": u(keys[0], (4 * H, I)),
        "w_hh0": u(keys[1], (4 * H, H)),
        "b_ih0": u(keys[2], (4 * H,)),
        "b_hh0": u(keys[3], (4 * H,)),
        # layer 1 of nn.LSTM
        "w_ih1": u(keys[4], (4 * H, H)),
        "w_hh1": u(keys[5], (4 * H, H)),
        "b_ih1": u(keys[6], (4 * H,)),
        "b_hh1": u(keys[7], (4 * H,)),
        # fc
        "w_fc": u(keys[8], (O, H)),
        "b_fc": u(keys[9], (O,)),
    }


def prepare_params(params):
    """One-time packing of all weights/biases into a single (8 + 4H, 4H) f32 slab.

    Row layout (8-row-aligned blocks so every in-kernel slice is tile-friendly):
      row 0        : W_ih(layer0)^T            (input_size == 1 -> one row)
      row 1        : b_ih0 + b_hh0
      row 2        : b_ih1 + b_hh1
      row 3        : fc bias (zero-padded to 4H lanes)
      rows 4..7    : zero padding
      rows 8..8+H  : W_hh(layer0)^T
      next H rows  : W_ih(layer1)^T
      next H rows  : W_hh(layer1)^T
      next H rows  : fc weight^T (zero-padded to 4H lanes)
    """
    H = params["w_hh0"].shape[1]
    I = params["w_ih0"].shape[1]
    O = params["w_fc"].shape[0]
    G = 4 * H
    assert I == 1, "kernel fuses the layer-0 input projection assuming a scalar input signal"
    assert O <= G
    f32 = jnp.float32

    head = jnp.zeros((8, G), f32)
    head = head.at[0:1, :].set(params["w_ih0"].T.astype(f32).reshape(1, G))
    head = head.at[1, :].set((params["b_ih0"] + params["b_hh0"]).astype(f32))
    head = head.at[2, :].set((params["b_ih1"] + params["b_hh1"]).astype(f32))
    head = head.at[3, :O].set(params["b_fc"].astype(f32))

    whh0 = params["w_hh0"].T.astype(f32)                                   # (H, 4H)
    wih1 = params["w_ih1"].T.astype(f32)                                   # (H, 4H)
    whh1 = params["w_hh1"].T.astype(f32)                                   # (H, 4H)
    wfc = jnp.zeros((H, G), f32).at[:, :O].set(params["w_fc"].T.astype(f32))

    return jnp.concatenate([head, whh0, wih1, whh1, wfc], axis=0)          # (8 + 4H, 4H)


@partial(jax.jit, static_argnames=("output_size",))
def lstm_prediction_forward(signals, slab, *, output_size):
    """signals: (B, T, 1) float32 (batch_first, like PyTorch)."""
    B, T, I = signals.shape
    assert I == 1
    G = slab.shape[1]
    x = signals.astype(jnp.float32).reshape(B, T)   # free bitcast; one scalar per (b, t)

    vmem = pl.BlockSpec(memory_space=pltpu.MemorySpace.VMEM)
    smem = pl.BlockSpec(memory_space=pltpu.MemorySpace.SMEM)
    return pl.pallas_call(
        lstm_prediction_kernel,
        out_shape=jax.ShapeDtypeStruct((B, output_size), jnp.float32),
        in_specs=[smem, vmem],
        out_specs=vmem,
        scratch_shapes=[pltpu.VMEM((T, B, G), jnp.float32)],
    )(x, slab)


def lstm_prediction_reference(signals, params):
    """Pure-JAX reference with PyTorch LSTM semantics, for verification."""
    B, T, I = signals.shape
    H = params["w_hh0"].shape[1]

    def cell(x_t, h, c, w_ih, w_hh, b_ih, b_hh):
        gates = x_t @ w_ih.T + b_ih + h @ w_hh.T + b_hh
        i = jax.nn.sigmoid(gates[:, 0 * H:1 * H])
        f = jax.nn.sigmoid(gates[:, 1 * H:2 * H])
        g = jnp.tanh(gates[:, 2 * H:3 * H])
        o = jax.nn.sigmoid(gates[:, 3 * H:4 * H])
        c_new = f * c + i * g
        return o * jnp.tanh(c_new), c_new

    h1 = c1 = h2 = c2 = jnp.zeros((B, H), jnp.float32)
    for t in range(T):
        x_t = signals[:, t, :]
        h1, c1 = cell(x_t, h1, c1, params["w_ih0"], params["w_hh0"],
                      params["b_ih0"], params["b_hh0"])
        h2, c2 = cell(h1, h2, c2, params["w_ih1"], params["w_hh1"],
                      params["b_ih1"], params["b_hh1"])
    logits = h2 @ params["w_fc"].T + params["b_fc"]
    return jax.nn.sigmoid(logits)


if __name__ == "__main__":
    # Module config: input_size=1 (scalar signal), hidden_size=32,
    # n_layers=3 -> nn.LSTM has n_layers-1 = 2 layers, output_size = prediction horizon = 4.
    B, T, I, H, O = 2, 8, 1, 32, 4

    key = jax.random.PRNGKey(0)
    k_params, k_data = jax.random.split(key)
    params = init_params(k_params, I, H, O)
    signals = jax.random.normal(k_data, (B, T, I), jnp.float32)

    slab = prepare_params(params)
    out = lstm_prediction_forward(signals, slab, output_size=O)
    out = jax.block_until_ready(out)

    ref = lstm_prediction_reference(signals, params)
    assert out.shape == (B, O)
    assert jnp.allclose(out, ref, atol=1e-5, rtol=1e-5), (out, ref)

    print("KERNEL_OK")
</pallas_src>

<mosaic_0001>
module attributes {stable_mosaic.version = 11 : i64} {
  func.func @lstm_prediction_kernel(%arg0: memref<2x8xf32, #tpu.memory_space<smem>>, %arg1: memref<136x128xf32, #tpu.memory_space<vmem>>, %arg2: memref<2x4xf32, #tpu.memory_space<vmem>>, %arg3: memref<8x2x128xf32, #tpu.memory_space<vmem>>) attributes {dimension_semantics = [], scalar_prefetch = 0 : i64, scratch_operands = 1 : i64, tpu.core_type = #tpu.core_type<tc>} {
    %c0 = arith.constant 0 : index
    %c0_0 = arith.constant 0 : index
    %0 = vector.load %arg1[%c0, %c0_0] : memref<136x128xf32, #tpu.memory_space<vmem>>, vector<1x128xf32>
    %c1 = arith.constant 1 : index
    %c0_1 = arith.constant 0 : index
    %1 = vector.load %arg1[%c1, %c0_1] : memref<136x128xf32, #tpu.memory_space<vmem>>, vector<1x128xf32>
    %c2 = arith.constant 2 : index
    %c0_2 = arith.constant 0 : index
    %2 = vector.load %arg1[%c2, %c0_2] : memref<136x128xf32, #tpu.memory_space<vmem>>, vector<1x128xf32>
    %c3 = arith.constant 3 : index
    %c0_3 = arith.constant 0 : index
    %3 = vector.load %arg1[%c3, %c0_3] : memref<136x128xf32, #tpu.memory_space<vmem>>, vector<1x128xf32>
    %c8 = arith.constant 8 : index
    %c0_4 = arith.constant 0 : index
    %4 = vector.load %arg1[%c8, %c0_4] : memref<136x128xf32, #tpu.memory_space<vmem>>, vector<32x128xf32>
    %c40 = arith.constant 40 : index
    %c0_5 = arith.constant 0 : index
    %5 = vector.load %arg1[%c40, %c0_5] : memref<136x128xf32, #tpu.memory_space<vmem>>, vector<32x128xf32>
    %c72 = arith.constant 72 : index
    %c0_6 = arith.constant 0 : index
    %6 = vector.load %arg1[%c72, %c0_6] : memref<136x128xf32, #tpu.memory_space<vmem>>, vector<32x128xf32>
    %c104 = arith.constant 104 : index
    %c0_7 = arith.constant 0 : index
    %7 = vector.load %arg1[%c104, %c0_7] : memref<136x128xf32, #tpu.memory_space<vmem>>, vector<32x128xf32>
    %8 = vector.shape_cast %2 : vector<1x128xf32> to vector<1x128xf32>
    %9 = vector.broadcast %8 : vector<1x128xf32> to vector<2x128xf32>
    %c0_8 = arith.constant 0 : index
    %c0_9 = arith.constant 0 : index
    %10 = memref.load %arg0[%c0_8, %c0_9] : memref<2x8xf32, #tpu.memory_space<smem>>
    %11 = vector.broadcast %10 : f32 to vector<1x128xf32>
    %12 = arith.mulf %11, %0 : vector<1x128xf32>
    %13 = arith.addf %12, %1 : vector<1x128xf32>
    %c1_10 = arith.constant 1 : index
    %c0_11 = arith.constant 0 : index
    %14 = memref.load %arg0[%c1_10, %c0_11] : memref<2x8xf32, #tpu.memory_space<smem>>
    %15 = vector.broadcast %14 : f32 to vector<1x128xf32>
    %16 = arith.mulf %15, %0 : vector<1x128xf32>
    %17 = arith.addf %16, %1 : vector<1x128xf32>
    %18 = tpu.concatenate %13, %17 in 0 : vector<1x128xf32>, vector<1x128xf32> -> vector<2x128xf32>
    %c0_12 = arith.constant 0 : index
    %c0_13 = arith.constant 0 : index
    %c0_14 = arith.constant 0 : index
    %19 = vector.load %arg3[%c0_12, %c0_13, %c0_14] : memref<8x2x128xf32, #tpu.memory_space<vmem>>, vector<1x2x128xf32>
    %20 = vector.shape_cast %19 : vector<1x2x128xf32> to vector<2x128xf32>
    %21 = vector.shape_cast %18 : vector<2x128xf32> to vector<1x2x128xf32>
    tpu.vector_store %arg3[%c0_12, %c0_13, %c0_14], %21 {strides = array<i32>} : memref<8x2x128xf32, #tpu.memory_space<vmem>>, vector<1x2x128xf32>,
    %c0_15 = arith.constant 0 : index
    %c1_16 = arith.constant 1 : index
    %22 = memref.load %arg0[%c0_15, %c1_16] : memref<2x8xf32, #tpu.memory_space<smem>>
    %23 = vector.broadcast %22 : f32 to vector<1x128xf32>
    %24 = arith.mulf %23, %0 : vector<1x128xf32>
    %25 = arith.addf %24, %1 : vector<1x128xf32>
    %c1_17 = arith.constant 1 : index
    %c1_18 = arith.constant 1 : index
    %26 = memref.load %arg0[%c1_17, %c1_18] : memref<2x8xf32, #tpu.memory_space<smem>>
    %27 = vector.broadcast %26 : f32 to vector<1x128xf32>
    %28 = arith.mulf %27, %0 : vector<1x128xf32>
    %29 = arith.addf %28, %1 : vector<1x128xf32>
    %30 = tpu.concatenate %25, %29 in 0 : vector<1x128xf32>, vector<1x128xf32> -> vector<2x128xf32>
    %c1_19 = arith.constant 1 : index
    %c0_20 = arith.constant 0 : index
    %c0_21 = arith.constant 0 : index
    %31 = vector.load %arg3[%c1_19, %c0_20, %c0_21] : memref<8x2x128xf32, #tpu.memory_space<vmem>>, vector<1x2x128xf32>
    %32 = vector.shape_cast %31 : vector<1x2x128xf32> to vector<2x128xf32>
    %33 = vector.shape_cast %30 : vector<2x128xf32> to vector<1x2x128xf32>
    tpu.vector_store %arg3[%c1_19, %c0_20, %c0_21], %33 {strides = array<i32>} : memref<8x2x128xf32, #tpu.memory_space<vmem>>, vector<1x2x128xf32>,
    %c0_22 = arith.constant 0 : index
    %c2_23 = arith.constant 2 : index
    %34 = memref.load %arg0[%c0_22, %c2_23] : memref<2x8xf32, #tpu.memory_space<smem>>
    %35 = vector.broadcast %34 : f32 to vector<1x128xf32>
    %36 = arith.mulf %35, %0 : vector<1x128xf32>
    %37 = arith.addf %36, %1 : vector<1x128xf32>
    %c1_24 = arith.constant 1 : index
    %c2_25 = arith.constant 2 : index
    %38 = memref.load %arg0[%c1_24, %c2_25] : memref<2x8xf32, #tpu.memory_space<smem>>
    %39 = vector.broadcast %38 : f32 to vector<1x128xf32>
    %40 = arith.mulf %39, %0 : vector<1x128xf32>
    %41 = arith.addf %40, %1 : vector<1x128xf32>
    %42 = tpu.concatenate %37, %41 in 0 : vector<1x128xf32>, vector<1x128xf32> -> vector<2x128xf32>
    %c2_26 = arith.constant 2 : index
    %c0_27 = arith.constant 0 : index
    %c0_28 = arith.constant 0 : index
    %43 = vector.load %arg3[%c2_26, %c0_27, %c0_28] : memref<8x2x128xf32, #tpu.memory_space<vmem>>, vector<1x2x128xf32>
    %44 = vector.shape_cast %43 : vector<1x2x128xf32> to vector<2x128xf32>
    %45 = vector.shape_cast %42 : vector<2x128xf32> to vector<1x2x128xf32>
    tpu.vector_store %arg3[%c2_26, %c0_27, %c0_28], %45 {strides = array<i32>} : memref<8x2x128xf32, #tpu.memory_space<vmem>>, vector<1x2x128xf32>,
    %c0_29 = arith.constant 0 : index
    %c3_30 = arith.constant 3 : index
    %46 = memref.load %arg0[%c0_29, %c3_30] : memref<2x8xf32, #tpu.memory_space<smem>>
    %47 = vector.broadcast %46 : f32 to vector<1x128xf32>
    %48 = arith.mulf %47, %0 : vector<1x128xf32>
    %49 = arith.addf %48, %1 : vector<1x128xf32>
    %c1_31 = arith.constant 1 : index
    %c3_32 = arith.constant 3 : index
    %50 = memref.load %arg0[%c1_31, %c3_32] : memref<2x8xf32, #tpu.memory_space<smem>>
    %51 = vector.broadcast %50 : f32 to vector<1x128xf32>
    %52 = arith.mulf %51, %0 : vector<1x128xf32>
    %53 = arith.addf %52, %1 : vector<1x128xf32>
    %54 = tpu.concatenate %49, %53 in 0 : vector<1x128xf32>, vector<1x128xf32> -> vector<2x128xf32>
    %c3_33 = arith.constant 3 : index
    %c0_34 = arith.constant 0 : index
    %c0_35 = arith.constant 0 : index
    %55 = vector.load %arg3[%c3_33, %c0_34, %c0_35] : memref<8x2x128xf32, #tpu.memory_space<vmem>>, vector<1x2x128xf32>
    %56 = vector.shape_cast %55 : vector<1x2x128xf32> to vector<2x128xf32>
    %57 = vector.shape_cast %54 : vector<2x128xf32> to vector<1x2x128xf32>
    tpu.vector_store %arg3[%c3_33, %c0_34, %c0_35], %57 {strides = array<i32>} : memref<8x2x128xf32, #tpu.memory_space<vmem>>, vector<1x2x128xf32>,
    %c0_36 = arith.constant 0 : index
    %c4 = arith.constant 4 : index
    %58 = memref.load %arg0[%c0_36, %c4] : memref<2x8xf32, #tpu.memory_space<smem>>
    %59 = vector.broadcast %58 : f32 to vector<1x128xf32>
    %60 = arith.mulf %59, %0 : vector<1x128xf32>
    %61 = arith.addf %60, %1 : vector<1x128xf32>
    %c1_37 = arith.constant 1 : index
    %c4_38 = arith.constant 4 : index
    %62 = memref.load %arg0[%c1_37, %c4_38] : memref<2x8xf32, #tpu.memory_space<smem>>
    %63 = vector.broadcast %62 : f32 to vector<1x128xf32>
    %64 = arith.mulf %63, %0 : vector<1x128xf32>
    %65 = arith.addf %64, %1 : vector<1x128xf32>
    %66 = tpu.concatenate %61, %65 in 0 : vector<1x128xf32>, vector<1x128xf32> -> vector<2x128xf32>
    %c4_39 = arith.constant 4 : index
    %c0_40 = arith.constant 0 : index
    %c0_41 = arith.constant 0 : index
    %67 = vector.load %arg3[%c4_39, %c0_40, %c0_41] : memref<8x2x128xf32, #tpu.memory_space<vmem>>, vector<1x2x128xf32>
    %68 = vector.shape_cast %67 : vector<1x2x128xf32> to vector<2x128xf32>
    %69 = vector.shape_cast %66 : vector<2x128xf32> to vector<1x2x128xf32>
    tpu.vector_store %arg3[%c4_39, %c0_40, %c0_41], %69 {strides = array<i32>} : memref<8x2x128xf32, #tpu.memory_space<vmem>>, vector<1x2x128xf32>,
    %c0_42 = arith.constant 0 : index
    %c5 = arith.constant 5 : index
    %70 = memref.load %arg0[%c0_42, %c5] : memref<2x8xf32, #tpu.memory_space<smem>>
    %71 = vector.broadcast %70 : f32 to vector<1x128xf32>
    %72 = arith.mulf %71, %0 : vector<1x128xf32>
    %73 = arith.addf %72, %1 : vector<1x128xf32>
    %c1_43 = arith.constant 1 : index
    %c5_44 = arith.constant 5 : index
    %74 = memref.load %arg0[%c1_43, %c5_44] : memref<2x8xf32, #tpu.memory_space<smem>>
    %75 = vector.broadcast %74 : f32 to vector<1x128xf32>
    %76 = arith.mulf %75, %0 : vector<1x128xf32>
    %77 = arith.addf %76, %1 : vector<1x128xf32>
    %78 = tpu.concatenate %73, %77 in 0 : vector<1x128xf32>, vector<1x128xf32> -> vector<2x128xf32>
    %c5_45 = arith.constant 5 : index
    %c0_46 = arith.constant 0 : index
    %c0_47 = arith.constant 0 : index
    %79 = vector.load %arg3[%c5_45, %c0_46, %c0_47] : memref<8x2x128xf32, #tpu.memory_space<vmem>>, vector<1x2x128xf32>
    %80 = vector.shape_cast %79 : vector<1x2x128xf32> to vector<2x128xf32>
    %81 = vector.shape_cast %78 : vector<2x128xf32> to vector<1x2x128xf32>
    tpu.vector_store %arg3[%c5_45, %c0_46, %c0_47], %81 {strides = array<i32>} : memref<8x2x128xf32, #tpu.memory_space<vmem>>, vector<1x2x128xf32>,
    %c0_48 = arith.constant 0 : index
    %c6 = arith.constant 6 : index
    %82 = memref.load %arg0[%c0_48, %c6] : memref<2x8xf32, #tpu.memory_space<smem>>
    %83 = vector.broadcast %82 : f32 to vector<1x128xf32>
    %84 = arith.mulf %83, %0 : vector<1x128xf32>
    %85 = arith.addf %84, %1 : vector<1x128xf32>
    %c1_49 = arith.constant 1 : index
    %c6_50 = arith.constant 6 : index
    %86 = memref.load %arg0[%c1_49, %c6_50] : memref<2x8xf32, #tpu.memory_space<smem>>
    %87 = vector.broadcast %86 : f32 to vector<1x128xf32>
    %88 = arith.mulf %87, %0 : vector<1x128xf32>
    %89 = arith.addf %88, %1 : vector<1x128xf32>
    %90 = tpu.concatenate %85, %89 in 0 : vector<1x128xf32>, vector<1x128xf32> -> vector<2x128xf32>
    %c6_51 = arith.constant 6 : index
    %c0_52 = arith.constant 0 : index
    %c0_53 = arith.constant 0 : index
    %91 = vector.load %arg3[%c6_51, %c0_52, %c0_53] : memref<8x2x128xf32, #tpu.memory_space<vmem>>, vector<1x2x128xf32>
    %92 = vector.shape_cast %91 : vector<1x2x128xf32> to vector<2x128xf32>
    %93 = vector.shape_cast %90 : vector<2x128xf32> to vector<1x2x128xf32>
    tpu.vector_store %arg3[%c6_51, %c0_52, %c0_53], %93 {strides = array<i32>} : memref<8x2x128xf32, #tpu.memory_space<vmem>>, vector<1x2x128xf32>,
    %c0_54 = arith.constant 0 : index
    %c7 = arith.constant 7 : index
    %94 = memref.load %arg0[%c0_54, %c7] : memref<2x8xf32, #tpu.memory_space<smem>>
    %95 = vector.broadcast %94 : f32 to vector<1x128xf32>
    %96 = arith.mulf %95, %0 : vector<1x128xf32>
    %97 = arith.addf %96, %1 : vector<1x128xf32>
    %c1_55 = arith.constant 1 : index
    %c7_56 = arith.constant 7 : index
    %98 = memref.load %arg0[%c1_55, %c7_56] : memref<2x8xf32, #tpu.memory_space<smem>>
    %99 = vector.broadcast %98 : f32 to vector<1x128xf32>
    %100 = arith.mulf %99, %0 : vector<1x128xf32>
    %101 = arith.addf %100, %1 : vector<1x128xf32>
    %102 = tpu.concatenate %97, %101 in 0 : vector<1x128xf32>, vector<1x128xf32> -> vector<2x128xf32>
    %c7_57 = arith.constant 7 : index
    %c0_58 = arith.constant 0 : index
    %c0_59 = arith.constant 0 : index
    %103 = vector.load %arg3[%c7_57, %c0_58, %c0_59] : memref<8x2x128xf32, #tpu.memory_space<vmem>>, vector<1x2x128xf32>
    %104 = vector.shape_cast %103 : vector<1x2x128xf32> to vector<2x128xf32>
    %105 = vector.shape_cast %102 : vector<2x128xf32> to vector<1x2x128xf32>
    tpu.vector_store %arg3[%c7_57, %c0_58, %c0_59], %105 {strides = array<i32>} : memref<8x2x128xf32, #tpu.memory_space<vmem>>, vector<1x2x128xf32>,
    %cst = arith.constant 0.000000e+00 : f32
    %106 = vector.broadcast %cst : f32 to vector<2x32xf32>
    %c0_i32 = arith.constant 0 : i32
    %cst_60 = arith.constant dense<0.000000e+00> : vector<2x128xf32>
    %107 = tpu.matmul %106, %6, %cst_60 {dimension_numbers = #tpu.dot_dimension_numbers<[1], [0], [0], [1], [0, 0, 1, 1], [], []>} : vector<2x32xf32>, vector<32x128xf32>, vector<2x128xf32> -> vector<2x128xf32>
    %108 = arith.addf %107, %9 : vector<2x128xf32>
    %109 = arith.index_cast %c0_i32 : i32 to index
    %c0_61 = arith.constant 0 : index
    %c0_62 = arith.constant 0 : index
    %110 = vector.load %arg3[%109, %c0_61, %c0_62] : memref<8x2x128xf32, #tpu.memory_space<vmem>>, vector<1x2x128xf32>
    %111 = vector.shape_cast %110 : vector<1x2x128xf32> to vector<2x128xf32>
    %cst_63 = arith.constant dense<0.000000e+00> : vector<2x128xf32>
    %112 = tpu.matmul %106, %4, %cst_63 {dimension_numbers = #tpu.dot_dimension_numbers<[1], [0], [0], [1], [0, 0, 1, 1], [], []>} : vector<2x32xf32>, vector<32x128xf32>, vector<2x128xf32> -> vector<2x128xf32>
    %113 = arith.addf %111, %112 : vector<2x128xf32>
    %cst_64 = arith.constant 5.000000e-01 : f32
    %114 = vector.broadcast %cst_64 : f32 to vector<2x128xf32>
    %115 = arith.mulf %114, %113 : vector<2x128xf32>
    %116 = math.tanh %115 : vector<2x128xf32>
    %cst_65 = arith.constant 1.000000e+00 : f32
    %117 = vector.broadcast %cst_65 : f32 to vector<2x128xf32>
    %118 = arith.addf %116, %117 : vector<2x128xf32>
    %cst_66 = arith.constant 5.000000e-01 : f32
    %119 = vector.broadcast %cst_66 : f32 to vector<2x128xf32>
    %120 = arith.mulf %119, %118 : vector<2x128xf32>
    %121 = math.tanh %113 : vector<2x128xf32>
    %122 = vector.extract_strided_slice %120 {offsets = [0, 0], sizes = [2, 32], strides = [1, 1]} : vector<2x128xf32> to vector<2x32xf32>
    %c96_i32 = arith.constant 96 : i32
    %123 = tpu.dynamic_rotate %120 by %c96_i32 dim 1 : vector<2x128xf32>, i32 -> vector<2x128xf32>
    %124 = vector.extract_strided_slice %123 {offsets = [0, 0], sizes = [2, 32], strides = [1, 1]} : vector<2x128xf32> to vector<2x32xf32>
    %c64_i32 = arith.constant 64 : i32
    %125 = tpu.dynamic_rotate %121 by %c64_i32 dim 1 : vector<2x128xf32>, i32 -> vector<2x128xf32>
    %126 = vector.extract_strided_slice %125 {offsets = [0, 0], sizes = [2, 32], strides = [1, 1]} : vector<2x128xf32> to vector<2x32xf32>
    %c32_i32 = arith.constant 32 : i32
    %127 = tpu.dynamic_rotate %120 by %c32_i32 dim 1 : vector<2x128xf32>, i32 -> vector<2x128xf32>
    %128 = vector.extract_strided_slice %127 {offsets = [0, 0], sizes = [2, 32], strides = [1, 1]} : vector<2x128xf32> to vector<2x32xf32>
    %129 = arith.mulf %124, %106 : vector<2x32xf32>
    %130 = arith.mulf %122, %126 : vector<2x32xf32>
    %131 = arith.addf %129, %130 : vector<2x32xf32>
    %132 = math.tanh %131 : vector<2x32xf32>
    %133 = arith.mulf %128, %132 : vector<2x32xf32>
    %cst_67 = arith.constant dense<0.000000e+00> : vector<2x128xf32>
    %134 = tpu.matmul %133, %5, %cst_67 {dimension_numbers = #tpu.dot_dimension_numbers<[1], [0], [0], [1], [0, 0, 1, 1], [], []>} : vector<2x32xf32>, vector<32x128xf32>, vector<2x128xf32> -> vector<2x128xf32>
    %135 = arith.addf %134, %108 : vector<2x128xf32>
    %cst_68 = arith.constant 5.000000e-01 : f32
    %136 = vector.broadcast %cst_68 : f32 to vector<2x128xf32>
    %137 = arith.mulf %136, %135 : vector<2x128xf32>
    %138 = math.tanh %137 : vector<2x128xf32>
    %cst_69 = arith.constant 1.000000e+00 : f32
    %139 = vector.broadcast %cst_69 : f32 to vector<2x128xf32>
    %140 = arith.addf %138, %139 : vector<2x128xf32>
    %cst_70 = arith.constant 5.000000e-01 : f32
    %141 = vector.broadcast %cst_70 : f32 to vector<2x128xf32>
    %142 = arith.mulf %141, %140 : vector<2x128xf32>
    %143 = math.tanh %135 : vector<2x128xf32>
    %144 = vector.extract_strided_slice %142 {offsets = [0, 0], sizes = [2, 32], strides = [1, 1]} : vector<2x128xf32> to vector<2x32xf32>
    %c96_i32_71 = arith.constant 96 : i32
    %145 = tpu.dynamic_rotate %142 by %c96_i32_71 dim 1 : vector<2x128xf32>, i32 -> vector<2x128xf32>
    %146 = vector.extract_strided_slice %145 {offsets = [0, 0], sizes = [2, 32], strides = [1, 1]} : vector<2x128xf32> to vector<2x32xf32>
    %c64_i32_72 = arith.constant 64 : i32
    %147 = tpu.dynamic_rotate %143 by %c64_i32_72 dim 1 : vector<2x128xf32>, i32 -> vector<2x128xf32>
    %148 = vector.extract_strided_slice %147 {offsets = [0, 0], sizes = [2, 32], strides = [1, 1]} : vector<2x128xf32> to vector<2x32xf32>
    %c32_i32_73 = arith.constant 32 : i32
    %149 = tpu.dynamic_rotate %142 by %c32_i32_73 dim 1 : vector<2x128xf32>, i32 -> vector<2x128xf32>
    %150 = vector.extract_strided_slice %149 {offsets = [0, 0], sizes = [2, 32], strides = [1, 1]} : vector<2x128xf32> to vector<2x32xf32>
    %151 = arith.mulf %146, %106 : vector<2x32xf32>
    %152 = arith.mulf %144, %148 : vector<2x32xf32>
    %153 = arith.addf %151, %152 : vector<2x32xf32>
    %154 = math.tanh %153 : vector<2x32xf32>
    %155 = arith.mulf %150, %154 : vector<2x32xf32>
    %c1_i32 = arith.constant 1 : i32
    %cst_74 = arith.constant dense<0.000000e+00> : vector<2x128xf32>
    %156 = tpu.matmul %155, %6, %cst_74 {dimension_numbers = #tpu.dot_dimension_numbers<[1], [0], [0], [1], [0, 0, 1, 1], [], []>} : vector<2x32xf32>, vector<32x128xf32>, vector<2x128xf32> -> vector<2x128xf32>
    %157 = arith.addf %156, %9 : vector<2x128xf32>
    %158 = arith.index_cast %c1_i32 : i32 to index
    %c0_75 = arith.constant 0 : index
    %c0_76 = arith.constant 0 : index
    %159 = vector.load %arg3[%158, %c0_75, %c0_76] : memref<8x2x128xf32, #tpu.memory_space<vmem>>, vector<1x2x128xf32>
    %160 = vector.shape_cast %159 : vector<1x2x128xf32> to vector<2x128xf32>
    %cst_77 = arith.constant dense<0.000000e+00> : vector<2x128xf32>
    %161 = tpu.matmul %133, %4, %cst_77 {dimension_numbers = #tpu.dot_dimension_numbers<[1], [0], [0], [1], [0, 0, 1, 1], [], []>} : vector<2x32xf32>, vector<32x128xf32>, vector<2x128xf32> -> vector<2x128xf32>
    %162 = arith.addf %160, %161 : vector<2x128xf32>
    %cst_78 = arith.constant 5.000000e-01 : f32
    %163 = vector.broadcast %cst_78 : f32 to vector<2x128xf32>
    %164 = arith.mulf %163, %162 : vector<2x128xf32>
    %165 = math.tanh %164 : vector<2x128xf32>
    %cst_79 = arith.constant 1.000000e+00 : f32
    %166 = vector.broadcast %cst_79 : f32 to vector<2x128xf32>
    %167 = arith.addf %165, %166 : vector<2x128xf32>
    %cst_80 = arith.constant 5.000000e-01 : f32
    %168 = vector.broadcast %cst_80 : f32 to vector<2x128xf32>
    %169 = arith.mulf %168, %167 : vector<2x128xf32>
    %170 = math.tanh %162 : vector<2x128xf32>
    %171 = vector.extract_strided_slice %169 {offsets = [0, 0], sizes = [2, 32], strides = [1, 1]} : vector<2x128xf32> to vector<2x32xf32>
    %c96_i32_81 = arith.constant 96 : i32
    %172 = tpu.dynamic_rotate %169 by %c96_i32_81 dim 1 : vector<2x128xf32>, i32 -> vector<2x128xf32>
    %173 = vector.extract_strided_slice %172 {offsets = [0, 0], sizes = [2, 32], strides = [1, 1]} : vector<2x128xf32> to vector<2x32xf32>
    %c64_i32_82 = arith.constant 64 : i32
    %174 = tpu.dynamic_rotate %170 by %c64_i32_82 dim 1 : vector<2x128xf32>, i32 -> vector<2x128xf32>
    %175 = vector.extract_strided_slice %174 {offsets = [0, 0], sizes = [2, 32], strides = [1, 1]} : vector<2x128xf32> to vector<2x32xf32>
    %c32_i32_83 = arith.constant 32 : i32
    %176 = tpu.dynamic_rotate %169 by %c32_i32_83 dim 1 : vector<2x128xf32>, i32 -> vector<2x128xf32>
    %177 = vector.extract_strided_slice %176 {offsets = [0, 0], sizes = [2, 32], strides = [1, 1]} : vector<2x128xf32> to vector<2x32xf32>
    %178 = arith.mulf %173, %131 : vector<2x32xf32>
    %179 = arith.mulf %171, %175 : vector<2x32xf32>
    %180 = arith.addf %178, %179 : vector<2x32xf32>
    %181 = math.tanh %180 : vector<2x32xf32>
    %182 = arith.mulf %177, %181 : vector<2x32xf32>
    %cst_84 = arith.constant dense<0.000000e+00> : vector<2x128xf32>
    %183 = tpu.matmul %182, %5, %cst_84 {dimension_numbers = #tpu.dot_dimension_numbers<[1], [0], [0], [1], [0, 0, 1, 1], [], []>} : vector<2x32xf32>, vector<32x128xf32>, vector<2x128xf32> -> vector<2x128xf32>
    %184 = arith.addf %183, %157 : vector<2x128xf32>
    %cst_85 = arith.constant 5.000000e-01 : f32
    %185 = vector.broadcast %cst_85 : f32 to vector<2x128xf32>
    %186 = arith.mulf %185, %184 : vector<2x128xf32>
    %187 = math.tanh %186 : vector<2x128xf32>
    %cst_86 = arith.constant 1.000000e+00 : f32
    %188 = vector.broadcast %cst_86 : f32 to vector<2x128xf32>
    %189 = arith.addf %187, %188 : vector<2x128xf32>
    %cst_87 = arith.constant 5.000000e-01 : f32
    %190 = vector.broadcast %cst_87 : f32 to vector<2x128xf32>
    %191 = arith.mulf %190, %189 : vector<2x128xf32>
    %192 = math.tanh %184 : vector<2x128xf32>
    %193 = vector.extract_strided_slice %191 {offsets = [0, 0], sizes = [2, 32], strides = [1, 1]} : vector<2x128xf32> to vector<2x32xf32>
    %c96_i32_88 = arith.constant 96 : i32
    %194 = tpu.dynamic_rotate %191 by %c96_i32_88 dim 1 : vector<2x128xf32>, i32 -> vector<2x128xf32>
    %195 = vector.extract_strided_slice %194 {offsets = [0, 0], sizes = [2, 32], strides = [1, 1]} : vector<2x128xf32> to vector<2x32xf32>
    %c64_i32_89 = arith.constant 64 : i32
    %196 = tpu.dynamic_rotate %192 by %c64_i32_89 dim 1 : vector<2x128xf32>, i32 -> vector<2x128xf32>
    %197 = vector.extract_strided_slice %196 {offsets = [0, 0], sizes = [2, 32], strides = [1, 1]} : vector<2x128xf32> to vector<2x32xf32>
    %c32_i32_90 = arith.constant 32 : i32
    %198 = tpu.dynamic_rotate %191 by %c32_i32_90 dim 1 : vector<2x128xf32>, i32 -> vector<2x128xf32>
    %199 = vector.extract_strided_slice %198 {offsets = [0, 0], sizes = [2, 32], strides = [1, 1]} : vector<2x128xf32> to vector<2x32xf32>
    %200 = arith.mulf %195, %153 : vector<2x32xf32>
    %201 = arith.mulf %193, %197 : vector<2x32xf32>
    %202 = arith.addf %200, %201 : vector<2x32xf32>
    %203 = math.tanh %202 : vector<2x32xf32>
    %204 = arith.mulf %199, %203 : vector<2x32xf32>
    %c2_i32 = arith.constant 2 : i32
    %cst_91 = arith.constant dense<0.000000e+00> : vector<2x128xf32>
    %205 = tpu.matmul %204, %6, %cst_91 {dimension_numbers = #tpu.dot_dimension_numbers<[1], [0], [0], [1], [0, 0, 1, 1], [], []>} : vector<2x32xf32>, vector<32x128xf32>, vector<2x128xf32> -> vector<2x128xf32>
    %206 = arith.addf %205, %9 : vector<2x128xf32>
    %207 = arith.index_cast %c2_i32 : i32 to index
    %c0_92 = arith.constant 0 : index
    %c0_93 = arith.constant 0 : index
    %208 = vector.load %arg3[%207, %c0_92, %c0_93] : memref<8x2x128xf32, #tpu.memory_space<vmem>>, vector<1x2x128xf32>
    %209 = vector.shape_cast %208 : vector<1x2x128xf32> to vector<2x128xf32>
    %cst_94 = arith.constant dense<0.000000e+00> : vector<2x128xf32>
    %210 = tpu.matmul %182, %4, %cst_94 {dimension_numbers = #tpu.dot_dimension_numbers<[1], [0], [0], [1], [0, 0, 1, 1], [], []>} : vector<2x32xf32>, vector<32x128xf32>, vector<2x128xf32> -> vector<2x128xf32>
    %211 = arith.addf %209, %210 : vector<2x128xf32>
    %cst_95 = arith.constant 5.000000e-01 : f32
    %212 = vector.broadcast %cst_95 : f32 to vector<2x128xf32>
    %213 = arith.mulf %212, %211 : vector<2x128xf32>
    %214 = math.tanh %213 : vector<2x128xf32>
    %cst_96 = arith.constant 1.000000e+00 : f32
    %215 = vector.broadcast %cst_96 : f32 to vector<2x128xf32>
    %216 = arith.addf %214, %215 : vector<2x128xf32>
    %cst_97 = arith.constant 5.000000e-01 : f32
    %217 = vector.broadcast %cst_97 : f32 to vector<2x128xf32>
    %218 = arith.mulf %217, %216 : vector<2x128xf32>
    %219 = math.tanh %211 : vector<2x128xf32>
    %220 = vector.extract_strided_slice %218 {offsets = [0, 0], sizes = [2, 32], strides = [1, 1]} : vector<2x128xf32> to vector<2x32xf32>
    %c96_i32_98 = arith.constant 96 : i32
    %221 = tpu.dynamic_rotate %218 by %c96_i32_98 dim 1 : vector<2x128xf32>, i32 -> vector<2x128xf32>
    %222 = vector.extract_strided_slice %221 {offsets = [0, 0], sizes = [2, 32], strides = [1, 1]} : vector<2x128xf32> to vector<2x32xf32>
    %c64_i32_99 = arith.constant 64 : i32
    %223 = tpu.dynamic_rotate %219 by %c64_i32_99 dim 1 : vector<2x128xf32>, i32 -> vector<2x128xf32>
    %224 = vector.extract_strided_slice %223 {offsets = [0, 0], sizes = [2, 32], strides = [1, 1]} : vector<2x128xf32> to vector<2x32xf32>
    %c32_i32_100 = arith.constant 32 : i32
    %225 = tpu.dynamic_rotate %218 by %c32_i32_100 dim 1 : vector<2x128xf32>, i32 -> vector<2x128xf32>
    %226 = vector.extract_strided_slice %225 {offsets = [0, 0], sizes = [2, 32], strides = [1, 1]} : vector<2x128xf32> to vector<2x32xf32>
    %227 = arith.mulf %222, %180 : vector<2x32xf32>
    %228 = arith.mulf %220, %224 : vector<2x32xf32>
    %229 = arith.addf %227, %228 : vector<2x32xf32>
    %230 = math.tanh %229 : vector<2x32xf32>
    %231 = arith.mulf %226, %230 : vector<2x32xf32>
    %cst_101 = arith.constant dense<0.000000e+00> : vector<2x128xf32>
    %232 = tpu.matmul %231, %5, %cst_101 {dimension_numbers = #tpu.dot_dimension_numbers<[1], [0], [0], [1], [0, 0, 1, 1], [], []>} : vector<2x32xf32>, vector<32x128xf32>, vector<2x128xf32> -> vector<2x128xf32>
    %233 = arith.addf %232, %206 : vector<2x128xf32>
    %cst_102 = arith.constant 5.000000e-01 : f32
    %234 = vector.broadcast %cst_102 : f32 to vector<2x128xf32>
    %235 = arith.mulf %234, %233 : vector<2x128xf32>
    %236 = math.tanh %235 : vector<2x128xf32>
    %cst_103 = arith.constant 1.000000e+00 : f32
    %237 = vector.broadcast %cst_103 : f32 to vector<2x128xf32>
    %238 = arith.addf %236, %237 : vector<2x128xf32>
    %cst_104 = arith.constant 5.000000e-01 : f32
    %239 = vector.broadcast %cst_104 : f32 to vector<2x128xf32>
    %240 = arith.mulf %239, %238 : vector<2x128xf32>
    %241 = math.tanh %233 : vector<2x128xf32>
    %242 = vector.extract_strided_slice %240 {offsets = [0, 0], sizes = [2, 32], strides = [1, 1]} : vector<2x128xf32> to vector<2x32xf32>
    %c96_i32_105 = arith.constant 96 : i32
    %243 = tpu.dynamic_rotate %240 by %c96_i32_105 dim 1 : vector<2x128xf32>, i32 -> vector<2x128xf32>
    %244 = vector.extract_strided_slice %243 {offsets = [0, 0], sizes = [2, 32], strides = [1, 1]} : vector<2x128xf32> to vector<2x32xf32>
    %c64_i32_106 = arith.constant 64 : i32
    %245 = tpu.dynamic_rotate %241 by %c64_i32_106 dim 1 : vector<2x128xf32>, i32 -> vector<2x128xf32>
    %246 = vector.extract_strided_slice %245 {offsets = [0, 0], sizes = [2, 32], strides = [1, 1]} : vector<2x128xf32> to vector<2x32xf32>
    %c32_i32_107 = arith.constant 32 : i32
    %247 = tpu.dynamic_rotate %240 by %c32_i32_107 dim 1 : vector<2x128xf32>, i32 -> vector<2x128xf32>
    %248 = vector.extract_strided_slice %247 {offsets = [0, 0], sizes = [2, 32], strides = [1, 1]} : vector<2x128xf32> to vector<2x32xf32>
    %249 = arith.mulf %244, %202 : vector<2x32xf32>
    %250 = arith.mulf %242, %246 : vector<2x32xf32>
    %251 = arith.addf %249, %250 : vector<2x32xf32>
    %252 = math.tanh %251 : vector<2x32xf32>
    %253 = arith.mulf %248, %252 : vector<2x32xf32>
    %c3_i32 = arith.constant 3 : i32
    %cst_108 = arith.constant dense<0.000000e+00> : vector<2x128xf32>
    %254 = tpu.matmul %253, %6, %cst_108 {dimension_numbers = #tpu.dot_dimension_numbers<[1], [0], [0], [1], [0, 0, 1, 1], [], []>} : vector<2x32xf32>, vector<32x128xf32>, vector<2x128xf32> -> vector<2x128xf32>
    %255 = arith.addf %254, %9 : vector<2x128xf32>
    %256 = arith.index_cast %c3_i32 : i32 to index
    %c0_109 = arith.constant 0 : index
    %c0_110 = arith.constant 0 : index
    %257 = vector.load %arg3[%256, %c0_109, %c0_110] : memref<8x2x128xf32, #tpu.memory_space<vmem>>, vector<1x2x128xf32>
    %258 = vector.shape_cast %257 : vector<1x2x128xf32> to vector<2x128xf32>
    %cst_111 = arith.constant dense<0.000000e+00> : vector<2x128xf32>
    %259 = tpu.matmul %231, %4, %cst_111 {dimension_numbers = #tpu.dot_dimension_numbers<[1], [0], [0], [1], [0, 0, 1, 1], [], []>} : vector<2x32xf32>, vector<32x128xf32>, vector<2x128xf32> -> vector<2x128xf32>
    %260 = arith.addf %258, %259 : vector<2x128xf32>
    %cst_112 = arith.constant 5.000000e-01 : f32
    %261 = vector.broadcast %cst_112 : f32 to vector<2x128xf32>
    %262 = arith.mulf %261, %260 : vector<2x128xf32>
    %263 = math.tanh %262 : vector<2x128xf32>
    %cst_113 = arith.constant 1.000000e+00 : f32
    %264 = vector.broadcast %cst_113 : f32 to vector<2x128xf32>
    %265 = arith.addf %263, %264 : vector<2x128xf32>
    %cst_114 = arith.constant 5.000000e-01 : f32
    %266 = vector.broadcast %cst_114 : f32 to vector<2x128xf32>
    %267 = arith.mulf %266, %265 : vector<2x128xf32>
    %268 = math.tanh %260 : vector<2x128xf32>
    %269 = vector.extract_strided_slice %267 {offsets = [0, 0], sizes = [2, 32], strides = [1, 1]} : vector<2x128xf32> to vector<2x32xf32>
    %c96_i32_115 = arith.constant 96 : i32
    %270 = tpu.dynamic_rotate %267 by %c96_i32_115 dim 1 : vector<2x128xf32>, i32 -> vector<2x128xf32>
    %271 = vector.extract_strided_slice %270 {offsets = [0, 0], sizes = [2, 32], strides = [1, 1]} : vector<2x128xf32> to vector<2x32xf32>
    %c64_i32_116 = arith.constant 64 : i32
    %272 = tpu.dynamic_rotate %268 by %c64_i32_116 dim 1 : vector<2x128xf32>, i32 -> vector<2x128xf32>
    %273 = vector.extract_strided_slice %272 {offsets = [0, 0], sizes = [2, 32], strides = [1, 1]} : vector<2x128xf32> to vector<2x32xf32>
    %c32_i32_117 = arith.constant 32 : i32
    %274 = tpu.dynamic_rotate %267 by %c32_i32_117 dim 1 : vector<2x128xf32>, i32 -> vector<2x128xf32>
    %275 = vector.extract_strided_slice %274 {offsets = [0, 0], sizes = [2, 32], strides = [1, 1]} : vector<2x128xf32> to vector<2x32xf32>
    %276 = arith.mulf %271, %229 : vector<2x32xf32>
    %277 = arith.mulf %269, %273 : vector<2x32xf32>
    %278 = arith.addf %276, %277 : vector<2x32xf32>
    %279 = math.tanh %278 : vector<2x32xf32>
    %280 = arith.mulf %275, %279 : vector<2x32xf32>
    %cst_118 = arith.constant dense<0.000000e+00> : vector<2x128xf32>
    %281 = tpu.matmul %280, %5, %cst_118 {dimension_numbers = #tpu.dot_dimension_numbers<[1], [0], [0], [1], [0, 0, 1, 1], [], []>} : vector<2x32xf32>, vector<32x128xf32>, vector<2x128xf32> -> vector<2x128xf32>
    %282 = arith.addf %281, %255 : vector<2x128xf32>
    %cst_119 = arith.constant 5.000000e-01 : f32
    %283 = vector.broadcast %cst_119 : f32 to vector<2x128xf32>
    %284 = arith.mulf %283, %282 : vector<2x128xf32>
    %285 = math.tanh %284 : vector<2x128xf32>
    %cst_120 = arith.constant 1.000000e+00 : f32
    %286 = vector.broadcast %cst_120 : f32 to vector<2x128xf32>
    %287 = arith.addf %285, %286 : vector<2x128xf32>
    %cst_121 = arith.constant 5.000000e-01 : f32
    %288 = vector.broadcast %cst_121 : f32 to vector<2x128xf32>
    %289 = arith.mulf %288, %287 : vector<2x128xf32>
    %290 = math.tanh %282 : vector<2x128xf32>
    %291 = vector.extract_strided_slice %289 {offsets = [0, 0], sizes = [2, 32], strides = [1, 1]} : vector<2x128xf32> to vector<2x32xf32>
    %c96_i32_122 = arith.constant 96 : i32
    %292 = tpu.dynamic_rotate %289 by %c96_i32_122 dim 1 : vector<2x128xf32>, i32 -> vector<2x128xf32>
    %293 = vector.extract_strided_slice %292 {offsets = [0, 0], sizes = [2, 32], strides = [1, 1]} : vector<2x128xf32> to vector<2x32xf32>
    %c64_i32_123 = arith.constant 64 : i32
    %294 = tpu.dynamic_rotate %290 by %c64_i32_123 dim 1 : vector<2x128xf32>, i32 -> vector<2x128xf32>
    %295 = vector.extract_strided_slice %294 {offsets = [0, 0], sizes = [2, 32], strides = [1, 1]} : vector<2x128xf32> to vector<2x32xf32>
    %c32_i32_124 = arith.constant 32 : i32
    %296 = tpu.dynamic_rotate %289 by %c32_i32_124 dim 1 : vector<2x128xf32>, i32 -> vector<2x128xf32>
    %297 = vector.extract_strided_slice %296 {offsets = [0, 0], sizes = [2, 32], strides = [1, 1]} : vector<2x128xf32> to vector<2x32xf32>
    %298 = arith.mulf %293, %251 : vector<2x32xf32>
    %299 = arith.mulf %291, %295 : vector<2x32xf32>
    %300 = arith.addf %298, %299 : vector<2x32xf32>
    %301 = math.tanh %300 : vector<2x32xf32>
    %302 = arith.mulf %297, %301 : vector<2x32xf32>
    %c4_i32 = arith.constant 4 : i32
    %cst_125 = arith.constant dense<0.000000e+00> : vector<2x128xf32>
    %303 = tpu.matmul %302, %6, %cst_125 {dimension_numbers = #tpu.dot_dimension_numbers<[1], [0], [0], [1], [0, 0, 1, 1], [], []>} : vector<2x32xf32>, vector<32x128xf32>, vector<2x128xf32> -> vector<2x128xf32>
    %304 = arith.addf %303, %9 : vector<2x128xf32>
    %305 = arith.index_cast %c4_i32 : i32 to index
    %c0_126 = arith.constant 0 : index
    %c0_127 = arith.constant 0 : index
    %306 = vector.load %arg3[%305, %c0_126, %c0_127] : memref<8x2x128xf32, #tpu.memory_space<vmem>>, vector<1x2x128xf32>
    %307 = vector.shape_cast %306 : vector<1x2x128xf32> to vector<2x128xf32>
    %cst_128 = arith.constant dense<0.000000e+00> : vector<2x128xf32>
    %308 = tpu.matmul %280, %4, %cst_128 {dimension_numbers = #tpu.dot_dimension_numbers<[1], [0], [0], [1], [0, 0, 1, 1], [], []>} : vector<2x32xf32>, vector<32x128xf32>, vector<2x128xf32> -> vector<2x128xf32>
    %309 = arith.addf %307, %308 : vector<2x128xf32>
    %cst_129 = arith.constant 5.000000e-01 : f32
    %310 = vector.broadcast %cst_129 : f32 to vector<2x128xf32>
    %311 = arith.mulf %310, %309 : vector<2x128xf32>
    %312 = math.tanh %311 : vector<2x128xf32>
    %cst_130 = arith.constant 1.000000e+00 : f32
    %313 = vector.broadcast %cst_130 : f32 to vector<2x128xf32>
    %314 = arith.addf %312, %313 : vector<2x128xf32>
    %cst_131 = arith.constant 5.000000e-01 : f32
    %315 = vector.broadcast %cst_131 : f32 to vector<2x128xf32>
    %316 = arith.mulf %315, %314 : vector<2x128xf32>
    %317 = math.tanh %309 : vector<2x128xf32>
    %318 = vector.extract_strided_slice %316 {offsets = [0, 0], sizes = [2, 32], strides = [1, 1]} : vector<2x128xf32> to vector<2x32xf32>
    %c96_i32_132 = arith.constant 96 : i32
    %319 = tpu.dynamic_rotate %316 by %c96_i32_132 dim 1 : vector<2x128xf32>, i32 -> vector<2x128xf32>
    %320 = vector.extract_strided_slice %319 {offsets = [0, 0], sizes = [2, 32], strides = [1, 1]} : vector<2x128xf32> to vector<2x32xf32>
    %c64_i32_133 = arith.constant 64 : i32
    %321 = tpu.dynamic_rotate %317 by %c64_i32_133 dim 1 : vector<2x128xf32>, i32 -> vector<2x128xf32>
    %322 = vector.extract_strided_slice %321 {offsets = [0, 0], sizes = [2, 32], strides = [1, 1]} : vector<2x128xf32> to vector<2x32xf32>
    %c32_i32_134 = arith.constant 32 : i32
    %323 = tpu.dynamic_rotate %316 by %c32_i32_134 dim 1 : vector<2x128xf32>, i32 -> vector<2x128xf32>
    %324 = vector.extract_strided_slice %323 {offsets = [0, 0], sizes = [2, 32], strides = [1, 1]} : vector<2x128xf32> to vector<2x32xf32>
    %325 = arith.mulf %320, %278 : vector<2x32xf32>
    %326 = arith.mulf %318, %322 : vector<2x32xf32>
    %327 = arith.addf %325, %326 : vector<2x32xf32>
    %328 = math.tanh %327 : vector<2x32xf32>
    %329 = arith.mulf %324, %328 : vector<2x32xf32>
    %cst_135 = arith.constant dense<0.000000e+00> : vector<2x128xf32>
    %330 = tpu.matmul %329, %5, %cst_135 {dimension_numbers = #tpu.dot_dimension_numbers<[1], [0], [0], [1], [0, 0, 1, 1], [], []>} : vector<2x32xf32>, vector<32x128xf32>, vector<2x128xf32> -> vector<2x128xf32>
    %331 = arith.addf %330, %304 : vector<2x128xf32>
    %cst_136 = arith.constant 5.000000e-01 : f32
    %332 = vector.broadcast %cst_136 : f32 to vector<2x128xf32>
    %333 = arith.mulf %332, %331 : vector<2x128xf32>
    %334 = math.tanh %333 : vector<2x128xf32>
    %cst_137 = arith.constant 1.000000e+00 : f32
    %335 = vector.broadcast %cst_137 : f32 to vector<2x128xf32>
    %336 = arith.addf %334, %335 : vector<2x128xf32>
    %cst_138 = arith.constant 5.000000e-01 : f32
    %337 = vector.broadcast %cst_138 : f32 to vector<2x128xf32>
    %338 = arith.mulf %337, %336 : vector<2x128xf32>
    %339 = math.tanh %331 : vector<2x128xf32>
    %340 = vector.extract_strided_slice %338 {offsets = [0, 0], sizes = [2, 32], strides = [1, 1]} : vector<2x128xf32> to vector<2x32xf32>
    %c96_i32_139 = arith.constant 96 : i32
    %341 = tpu.dynamic_rotate %338 by %c96_i32_139 dim 1 : vector<2x128xf32>, i32 -> vector<2x128xf32>
    %342 = vector.extract_strided_slice %341 {offsets = [0, 0], sizes = [2, 32], strides = [1, 1]} : vector<2x128xf32> to vector<2x32xf32>
    %c64_i32_140 = arith.constant 64 : i32
    %343 = tpu.dynamic_rotate %339 by %c64_i32_140 dim 1 : vector<2x128xf32>, i32 -> vector<2x128xf32>
    %344 = vector.extract_strided_slice %343 {offsets = [0, 0], sizes = [2, 32], strides = [1, 1]} : vector<2x128xf32> to vector<2x32xf32>
    %c32_i32_141 = arith.constant 32 : i32
    %345 = tpu.dynamic_rotate %338 by %c32_i32_141 dim 1 : vector<2x128xf32>, i32 -> vector<2x128xf32>
    %346 = vector.extract_strided_slice %345 {offsets = [0, 0], sizes = [2, 32], strides = [1, 1]} : vector<2x128xf32> to vector<2x32xf32>
    %347 = arith.mulf %342, %300 : vector<2x32xf32>
    %348 = arith.mulf %340, %344 : vector<2x32xf32>
    %349 = arith.addf %347, %348 : vector<2x32xf32>
    %350 = math.tanh %349 : vector<2x32xf32>
    %351 = arith.mulf %346, %350 : vector<2x32xf32>
    %c5_i32 = arith.constant 5 : i32
    %cst_142 = arith.constant dense<0.000000e+00> : vector<2x128xf32>
    %352 = tpu.matmul %351, %6, %cst_142 {dimension_numbers = #tpu.dot_dimension_numbers<[1], [0], [0], [1], [0, 0, 1, 1], [], []>} : vector<2x32xf32>, vector<32x128xf32>, vector<2x128xf32> -> vector<2x128xf32>
    %353 = arith.addf %352, %9 : vector<2x128xf32>
    %354 = arith.index_cast %c5_i32 : i32 to index
    %c0_143 = arith.constant 0 : index
    %c0_144 = arith.constant 0 : index
    %355 = vector.load %arg3[%354, %c0_143, %c0_144] : memref<8x2x128xf32, #tpu.memory_space<vmem>>, vector<1x2x128xf32>
    %356 = vector.shape_cast %355 : vector<1x2x128xf32> to vector<2x128xf32>
    %cst_145 = arith.constant dense<0.000000e+00> : vector<2x128xf32>
    %357 = tpu.matmul %329, %4, %cst_145 {dimension_numbers = #tpu.dot_dimension_numbers<[1], [0], [0], [1], [0, 0, 1, 1], [], []>} : vector<2x32xf32>, vector<32x128xf32>, vector<2x128xf32> -> vector<2x128xf32>
    %358 = arith.addf %356, %357 : vector<2x128xf32>
    %cst_146 = arith.constant 5.000000e-01 : f32
    %359 = vector.broadcast %cst_146 : f32 to vector<2x128xf32>
    %360 = arith.mulf %359, %358 : vector<2x128xf32>
    %361 = math.tanh %360 : vector<2x128xf32>
    %cst_147 = arith.constant 1.000000e+00 : f32
    %362 = vector.broadcast %cst_147 : f32 to vector<2x128xf32>
    %363 = arith.addf %361, %362 : vector<2x128xf32>
    %cst_148 = arith.constant 5.000000e-01 : f32
    %364 = vector.broadcast %cst_148 : f32 to vector<2x128xf32>
    %365 = arith.mulf %364, %363 : vector<2x128xf32>
    %366 = math.tanh %358 : vector<2x128xf32>
    %367 = vector.extract_strided_slice %365 {offsets = [0, 0], sizes = [2, 32], strides = [1, 1]} : vector<2x128xf32> to vector<2x32xf32>
    %c96_i32_149 = arith.constant 96 : i32
    %368 = tpu.dynamic_rotate %365 by %c96_i32_149 dim 1 : vector<2x128xf32>, i32 -> vector<2x128xf32>
    %369 = vector.extract_strided_slice %368 {offsets = [0, 0], sizes = [2, 32], strides = [1, 1]} : vector<2x128xf32> to vector<2x32xf32>
    %c64_i32_150 = arith.constant 64 : i32
    %370 = tpu.dynamic_rotate %366 by %c64_i32_150 dim 1 : vector<2x128xf32>, i32 -> vector<2x128xf32>
    %371 = vector.extract_strided_slice %370 {offsets = [0, 0], sizes = [2, 32], strides = [1, 1]} : vector<2x128xf32> to vector<2x32xf32>
    %c32_i32_151 = arith.constant 32 : i32
    %372 = tpu.dynamic_rotate %365 by %c32_i32_151 dim 1 : vector<2x128xf32>, i32 -> vector<2x128xf32>
    %373 = vector.extract_strided_slice %372 {offsets = [0, 0], sizes = [2, 32], strides = [1, 1]} : vector<2x128xf32> to vector<2x32xf32>
    %374 = arith.mulf %369, %327 : vector<2x32xf32>
    %375 = arith.mulf %367, %371 : vector<2x32xf32>
    %376 = arith.addf %374, %375 : vector<2x32xf32>
    %377 = math.tanh %376 : vector<2x32xf32>
    %378 = arith.mulf %373, %377 : vector<2x32xf32>
    %cst_152 = arith.constant dense<0.000000e+00> : vector<2x128xf32>
    %379 = tpu.matmul %378, %5, %cst_152 {dimension_numbers = #tpu.dot_dimension_numbers<[1], [0], [0], [1], [0, 0, 1, 1], [], []>} : vector<2x32xf32>, vector<32x128xf32>, vector<2x128xf32> -> vector<2x128xf32>
    %380 = arith.addf %379, %353 : vector<2x128xf32>
    %cst_153 = arith.constant 5.000000e-01 : f32
    %381 = vector.broadcast %cst_153 : f32 to vector<2x128xf32>
    %382 = arith.mulf %381, %380 : vector<2x128xf32>
    %383 = math.tanh %382 : vector<2x128xf32>
    %cst_154 = arith.constant 1.000000e+00 : f32
    %384 = vector.broadcast %cst_154 : f32 to vector<2x128xf32>
    %385 = arith.addf %383, %384 : vector<2x128xf32>
    %cst_155 = arith.constant 5.000000e-01 : f32
    %386 = vector.broadcast %cst_155 : f32 to vector<2x128xf32>
    %387 = arith.mulf %386, %385 : vector<2x128xf32>
    %388 = math.tanh %380 : vector<2x128xf32>
    %389 = vector.extract_strided_slice %387 {offsets = [0, 0], sizes = [2, 32], strides = [1, 1]} : vector<2x128xf32> to vector<2x32xf32>
    %c96_i32_156 = arith.constant 96 : i32
    %390 = tpu.dynamic_rotate %387 by %c96_i32_156 dim 1 : vector<2x128xf32>, i32 -> vector<2x128xf32>
    %391 = vector.extract_strided_slice %390 {offsets = [0, 0], sizes = [2, 32], strides = [1, 1]} : vector<2x128xf32> to vector<2x32xf32>
    %c64_i32_157 = arith.constant 64 : i32
    %392 = tpu.dynamic_rotate %388 by %c64_i32_157 dim 1 : vector<2x128xf32>, i32 -> vector<2x128xf32>
    %393 = vector.extract_strided_slice %392 {offsets = [0, 0], sizes = [2, 32], strides = [1, 1]} : vector<2x128xf32> to vector<2x32xf32>
    %c32_i32_158 = arith.constant 32 : i32
    %394 = tpu.dynamic_rotate %387 by %c32_i32_158 dim 1 : vector<2x128xf32>, i32 -> vector<2x128xf32>
    %395 = vector.extract_strided_slice %394 {offsets = [0, 0], sizes = [2, 32], strides = [1, 1]} : vector<2x128xf32> to vector<2x32xf32>
    %396 = arith.mulf %391, %349 : vector<2x32xf32>
    %397 = arith.mulf %389, %393 : vector<2x32xf32>
    %398 = arith.addf %396, %397 : vector<2x32xf32>
    %399 = math.tanh %398 : vector<2x32xf32>
    %400 = arith.mulf %395, %399 : vector<2x32xf32>
    %c6_i32 = arith.constant 6 : i32
    %cst_159 = arith.constant dense<0.000000e+00> : vector<2x128xf32>
    %401 = tpu.matmul %400, %6, %cst_159 {dimension_numbers = #tpu.dot_dimension_numbers<[1], [0], [0], [1], [0, 0, 1, 1], [], []>} : vector<2x32xf32>, vector<32x128xf32>, vector<2x128xf32> -> vector<2x128xf32>
    %402 = arith.addf %401, %9 : vector<2x128xf32>
    %403 = arith.index_cast %c6_i32 : i32 to index
    %c0_160 = arith.constant 0 : index
    %c0_161 = arith.constant 0 : index
    %404 = vector.load %arg3[%403, %c0_160, %c0_161] : memref<8x2x128xf32, #tpu.memory_space<vmem>>, vector<1x2x128xf32>
    %405 = vector.shape_cast %404 : vector<1x2x128xf32> to vector<2x128xf32>
    %cst_162 = arith.constant dense<0.000000e+00> : vector<2x128xf32>
    %406 = tpu.matmul %378, %4, %cst_162 {dimension_numbers = #tpu.dot_dimension_numbers<[1], [0], [0], [1], [0, 0, 1, 1], [], []>} : vector<2x32xf32>, vector<32x128xf32>, vector<2x128xf32> -> vector<2x128xf32>
    %407 = arith.addf %405, %406 : vector<2x128xf32>
    %cst_163 = arith.constant 5.000000e-01 : f32
    %408 = vector.broadcast %cst_163 : f32 to vector<2x128xf32>
    %409 = arith.mulf %408, %407 : vector<2x128xf32>
    %410 = math.tanh %409 : vector<2x128xf32>
    %cst_164 = arith.constant 1.000000e+00 : f32
    %411 = vector.broadcast %cst_164 : f32 to vector<2x128xf32>
    %412 = arith.addf %410, %411 : vector<2x128xf32>
    %cst_165 = arith.constant 5.000000e-01 : f32
    %413 = vector.broadcast %cst_165 : f32 to vector<2x128xf32>
    %414 = arith.mulf %413, %412 : vector<2x128xf32>
    %415 = math.tanh %407 : vector<2x128xf32>
    %416 = vector.extract_strided_slice %414 {offsets = [0, 0], sizes = [2, 32], strides = [1, 1]} : vector<2x128xf32> to vector<2x32xf32>
    %c96_i32_166 = arith.constant 96 : i32
    %417 = tpu.dynamic_rotate %414 by %c96_i32_166 dim 1 : vector<2x128xf32>, i32 -> vector<2x128xf32>
    %418 = vector.extract_strided_slice %417 {offsets = [0, 0], sizes = [2, 32], strides = [1, 1]} : vector<2x128xf32> to vector<2x32xf32>
    %c64_i32_167 = arith.constant 64 : i32
    %419 = tpu.dynamic_rotate %415 by %c64_i32_167 dim 1 : vector<2x128xf32>, i32 -> vector<2x128xf32>
    %420 = vector.extract_strided_slice %419 {offsets = [0, 0], sizes = [2, 32], strides = [1, 1]} : vector<2x128xf32> to vector<2x32xf32>
    %c32_i32_168 = arith.constant 32 : i32
    %421 = tpu.dynamic_rotate %414 by %c32_i32_168 dim 1 : vector<2x128xf32>, i32 -> vector<2x128xf32>
    %422 = vector.extract_strided_slice %421 {offsets = [0, 0], sizes = [2, 32], strides = [1, 1]} : vector<2x128xf32> to vector<2x32xf32>
    %423 = arith.mulf %418, %376 : vector<2x32xf32>
    %424 = arith.mulf %416, %420 : vector<2x32xf32>
    %425 = arith.addf %423, %424 : vector<2x32xf32>
    %426 = math.tanh %425 : vector<2x32xf32>
    %427 = arith.mulf %422, %426 : vector<2x32xf32>
    %cst_169 = arith.constant dense<0.000000e+00> : vector<2x128xf32>
    %428 = tpu.matmul %427, %5, %cst_169 {dimension_numbers = #tpu.dot_dimension_numbers<[1], [0], [0], [1], [0, 0, 1, 1], [], []>} : vector<2x32xf32>, vector<32x128xf32>, vector<2x128xf32> -> vector<2x128xf32>
    %429 = arith.addf %428, %402 : vector<2x128xf32>
    %cst_170 = arith.constant 5.000000e-01 : f32
    %430 = vector.broadcast %cst_170 : f32 to vector<2x128xf32>
    %431 = arith.mulf %430, %429 : vector<2x128xf32>
    %432 = math.tanh %431 : vector<2x128xf32>
    %cst_171 = arith.constant 1.000000e+00 : f32
    %433 = vector.broadcast %cst_171 : f32 to vector<2x128xf32>
    %434 = arith.addf %432, %433 : vector<2x128xf32>
    %cst_172 = arith.constant 5.000000e-01 : f32
    %435 = vector.broadcast %cst_172 : f32 to vector<2x128xf32>
    %436 = arith.mulf %435, %434 : vector<2x128xf32>
    %437 = math.tanh %429 : vector<2x128xf32>
    %438 = vector.extract_strided_slice %436 {offsets = [0, 0], sizes = [2, 32], strides = [1, 1]} : vector<2x128xf32> to vector<2x32xf32>
    %c96_i32_173 = arith.constant 96 : i32
    %439 = tpu.dynamic_rotate %436 by %c96_i32_173 dim 1 : vector<2x128xf32>, i32 -> vector<2x128xf32>
    %440 = vector.extract_strided_slice %439 {offsets = [0, 0], sizes = [2, 32], strides = [1, 1]} : vector<2x128xf32> to vector<2x32xf32>
    %c64_i32_174 = arith.constant 64 : i32
    %441 = tpu.dynamic_rotate %437 by %c64_i32_174 dim 1 : vector<2x128xf32>, i32 -> vector<2x128xf32>
    %442 = vector.extract_strided_slice %441 {offsets = [0, 0], sizes = [2, 32], strides = [1, 1]} : vector<2x128xf32> to vector<2x32xf32>
    %c32_i32_175 = arith.constant 32 : i32
    %443 = tpu.dynamic_rotate %436 by %c32_i32_175 dim 1 : vector<2x128xf32>, i32 -> vector<2x128xf32>
    %444 = vector.extract_strided_slice %443 {offsets = [0, 0], sizes = [2, 32], strides = [1, 1]} : vector<2x128xf32> to vector<2x32xf32>
    %445 = arith.mulf %440, %398 : vector<2x32xf32>
    %446 = arith.mulf %438, %442 : vector<2x32xf32>
    %447 = arith.addf %445, %446 : vector<2x32xf32>
    %448 = math.tanh %447 : vector<2x32xf32>
    %449 = arith.mulf %444, %448 : vector<2x32xf32>
    %c7_i32 = arith.constant 7 : i32
    %cst_176 = arith.constant dense<0.000000e+00> : vector<2x128xf32>
    %450 = tpu.matmul %449, %6, %cst_176 {dimension_numbers = #tpu.dot_dimension_numbers<[1], [0], [0], [1], [0, 0, 1, 1], [], []>} : vector<2x32xf32>, vector<32x128xf32>, vector<2x128xf32> -> vector<2x128xf32>
    %451 = arith.addf %450, %9 : vector<2x128xf32>
    %452 = arith.index_cast %c7_i32 : i32 to index
    %c0_177 = arith.constant 0 : index
    %c0_178 = arith.constant 0 : index
    %453 = vector.load %arg3[%452, %c0_177, %c0_178] : memref<8x2x128xf32, #tpu.memory_space<vmem>>, vector<1x2x128xf32>
    %454 = vector.shape_cast %453 : vector<1x2x128xf32> to vector<2x128xf32>
    %cst_179 = arith.constant dense<0.000000e+00> : vector<2x128xf32>
    %455 = tpu.matmul %427, %4, %cst_179 {dimension_numbers = #tpu.dot_dimension_numbers<[1], [0], [0], [1], [0, 0, 1, 1], [], []>} : vector<2x32xf32>, vector<32x128xf32>, vector<2x128xf32> -> vector<2x128xf32>
    %456 = arith.addf %454, %455 : vector<2x128xf32>
    %cst_180 = arith.constant 5.000000e-01 : f32
    %457 = vector.broadcast %cst_180 : f32 to vector<2x128xf32>
    %458 = arith.mulf %457, %456 : vector<2x128xf32>
    %459 = math.tanh %458 : vector<2x128xf32>
    %cst_181 = arith.constant 1.000000e+00 : f32
    %460 = vector.broadcast %cst_181 : f32 to vector<2x128xf32>
    %461 = arith.addf %459, %460 : vector<2x128xf32>
    %cst_182 = arith.constant 5.000000e-01 : f32
    %462 = vector.broadcast %cst_182 : f32 to vector<2x128xf32>
    %463 = arith.mulf %462, %461 : vector<2x128xf32>
    %464 = math.tanh %456 : vector<2x128xf32>
    %465 = vector.extract_strided_slice %463 {offsets = [0, 0], sizes = [2, 32], strides = [1, 1]} : vector<2x128xf32> to vector<2x32xf32>
    %c96_i32_183 = arith.constant 96 : i32
    %466 = tpu.dynamic_rotate %463 by %c96_i32_183 dim 1 : vector<2x128xf32>, i32 -> vector<2x128xf32>
    %467 = vector.extract_strided_slice %466 {offsets = [0, 0], sizes = [2, 32], strides = [1, 1]} : vector<2x128xf32> to vector<2x32xf32>
    %c64_i32_184 = arith.constant 64 : i32
    %468 = tpu.dynamic_rotate %464 by %c64_i32_184 dim 1 : vector<2x128xf32>, i32 -> vector<2x128xf32>
    %469 = vector.extract_strided_slice %468 {offsets = [0, 0], sizes = [2, 32], strides = [1, 1]} : vector<2x128xf32> to vector<2x32xf32>
    %c32_i32_185 = arith.constant 32 : i32
    %470 = tpu.dynamic_rotate %463 by %c32_i32_185 dim 1 : vector<2x128xf32>, i32 -> vector<2x128xf32>
    %471 = vector.extract_strided_slice %470 {offsets = [0, 0], sizes = [2, 32], strides = [1, 1]} : vector<2x128xf32> to vector<2x32xf32>
    %472 = arith.mulf %467, %425 : vector<2x32xf32>
    %473 = arith.mulf %465, %469 : vector<2x32xf32>
    %474 = arith.addf %472, %473 : vector<2x32xf32>
    %475 = math.tanh %474 : vector<2x32xf32>
    %476 = arith.mulf %471, %475 : vector<2x32xf32>
    %cst_186 = arith.constant dense<0.000000e+00> : vector<2x128xf32>
    %477 = tpu.matmul %476, %5, %cst_186 {dimension_numbers = #tpu.dot_dimension_numbers<[1], [0], [0], [1], [0, 0, 1, 1], [], []>} : vector<2x32xf32>, vector<32x128xf32>, vector<2x128xf32> -> vector<2x128xf32>
    %478 = arith.addf %477, %451 : vector<2x128xf32>
    %cst_187 = arith.constant 5.000000e-01 : f32
    %479 = vector.broadcast %cst_187 : f32 to vector<2x128xf32>
    %480 = arith.mulf %479, %478 : vector<2x128xf32>
    %481 = math.tanh %480 : vector<2x128xf32>
    %cst_188 = arith.constant 1.000000e+00 : f32
    %482 = vector.broadcast %cst_188 : f32 to vector<2x128xf32>
    %483 = arith.addf %481, %482 : vector<2x128xf32>
    %cst_189 = arith.constant 5.000000e-01 : f32
    %484 = vector.broadcast %cst_189 : f32 to vector<2x128xf32>
    %485 = arith.mulf %484, %483 : vector<2x128xf32>
    %486 = math.tanh %478 : vector<2x128xf32>
    %487 = vector.extract_strided_slice %485 {offsets = [0, 0], sizes = [2, 32], strides = [1, 1]} : vector<2x128xf32> to vector<2x32xf32>
    %c96_i32_190 = arith.constant 96 : i32
    %488 = tpu.dynamic_rotate %485 by %c96_i32_190 dim 1 : vector<2x128xf32>, i32 -> vector<2x128xf32>
    %489 = vector.extract_strided_slice %488 {offsets = [0, 0], sizes = [2, 32], strides = [1, 1]} : vector<2x128xf32> to vector<2x32xf32>
    %c64_i32_191 = arith.constant 64 : i32
    %490 = tpu.dynamic_rotate %486 by %c64_i32_191 dim 1 : vector<2x128xf32>, i32 -> vector<2x128xf32>
    %491 = vector.extract_strided_slice %490 {offsets = [0, 0], sizes = [2, 32], strides = [1, 1]} : vector<2x128xf32> to vector<2x32xf32>
    %c32_i32_192 = arith.constant 32 : i32
    %492 = tpu.dynamic_rotate %485 by %c32_i32_192 dim 1 : vector<2x128xf32>, i32 -> vector<2x128xf32>
    %493 = vector.extract_strided_slice %492 {offsets = [0, 0], sizes = [2, 32], strides = [1, 1]} : vector<2x128xf32> to vector<2x32xf32>
    %494 = arith.mulf %489, %447 : vector<2x32xf32>
    %495 = arith.mulf %487, %491 : vector<2x32xf32>
    %496 = arith.addf %494, %495 : vector<2x32xf32>
    %497 = math.tanh %496 : vector<2x32xf32>
    %498 = arith.mulf %493, %497 : vector<2x32xf32>
    %c8_i32 = arith.constant 8 : i32
    %cst_193 = arith.constant dense<0.000000e+00> : vector<2x128xf32>
    %499 = tpu.matmul %498, %7, %cst_193 {dimension_numbers = #tpu.dot_dimension_numbers<[1], [0], [0], [1], [0, 0, 1, 1], [], []>} : vector<2x32xf32>, vector<32x128xf32>, vector<2x128xf32> -> vector<2x128xf32>
    %500 = vector.broadcast %3 : vector<1x128xf32> to vector<2x128xf32>
    %501 = arith.addf %499, %500 : vector<2x128xf32>
    %502 = vector.extract_strided_slice %501 {offsets = [0, 0], sizes = [2, 4], strides = [1, 1]} : vector<2x128xf32> to vector<2x4xf32>
    %cst_194 = arith.constant 5.000000e-01 : f32
    %503 = vector.broadcast %cst_194 : f32 to vector<2x4xf32>
    %504 = arith.mulf %503, %502 : vector<2x4xf32>
    %505 = math.tanh %504 : vector<2x4xf32>
    %cst_195 = arith.constant 1.000000e+00 : f32
    %506 = vector.broadcast %cst_195 : f32 to vector<2x4xf32>
    %507 = arith.addf %505, %506 : vector<2x4xf32>
    %cst_196 = arith.constant 5.000000e-01 : f32
    %508 = vector.broadcast %cst_196 : f32 to vector<2x4xf32>
    %509 = arith.mulf %508, %507 : vector<2x4xf32>
    %c0_197 = arith.constant 0 : index
    %c0_198 = arith.constant 0 : index
    %510 = vector.load %arg2[%c0_197, %c0_198] : memref<2x4xf32, #tpu.memory_space<vmem>>, vector<2x4xf32>
    tpu.vector_store %arg2[%c0_197, %c0_198], %509 {strides = array<i32>} : memref<2x4xf32, #tpu.memory_space<vmem>>, vector<2x4xf32>,
    return
  }
}

</mosaic_0001>

<bundles_post_ra>
// kernel: lstm_prediction_forward.1
= control target key start
LH: loop header
LB: loop body
LE: loop exit
PB: predicated region body
PF: predicated region fallthrough
CT: control target
= control target key end

     0   :  { %7 = vsyncpa [#allocation6], 0  ;;  %s1538_s0 = inlined_call_operand.hbm [shape: f32[2,8], index: 0, kind: input, shape index: {}]   ;;  %s1539_s1 = inlined_call_operand.hbm [shape: f32[136,128], index: 1, kind: input, shape index: {}]   ;;  %s1540_s2 = inlined_call_operand.hbm [shape: f32[2,4], index: 2, kind: output, shape index: {}]  }
   0x1   :  { %8 = vsyncpa [#allocation4], 0 }
   0x2   :  { %9 = vsyncpa [#allocation5], 0  ;;  %s15_s11 = sshll.u32 %s1538_s0, 4  ;;  %s23_s14 = sshll.u32 %s1539_s1, 4  ;;  %s16_s11 = int_to_ptr.hbm [resolvable:$true] %s15_s11  ;;  %s24_s14 = int_to_ptr.hbm [resolvable:$true] %s23_s14 }
   0x3   :  { %s1236_s15 = smov [#allocation3]   ;;  %s1237_s16 = smov [#allocation7]  }
   0x4   :  { %18 = dma.hbm_to_smem %s16_s11, 32, %s1236_s15, [#allocation6]  }
   0x5   :  { %s25_s17 = sshll.u32 %s1237_s16, 4  ;;  %s1238_s18 = smov 128   ;;  %s26_s17 = int_to_ptr.vmem [resolvable:$true] %s25_s17 }
   0x6   :  { %s1239_s19 = smov 8  }
   0x7   :  { %31 = dma.hbm_to_vmem [thread:$0]  %s24_s14, 2176, %s26_s17, [#allocation4], %s1238_s18, %s1238_s18, %s1239_s19  }
   0x8   :  { %1230 = dma.done.wait [#allocation6], 32  }
   0x9   :  { %1231 = vsyncadd [#allocation6], 4294967264 }
   0xa   :  { %1232 = dma.done.wait [#allocation4], 2176  }
   0xb   :  { %1233 = vsyncadd [#allocation4], 4294965120 }
   0xc   :  { %40 = sfence }
   0xd   :  { %v1266_v0 = vld [vmem:[#allocation7 + $0x20] sm:$0xff]  ;;  %v1268_v1 = vld [vmem:[#allocation7 + $0x18] sm:$0xff]  ;;  %s62_s0 = sld [smem:[#allocation3]]  ;;  %v1271_v2 = vld [vmem:[#allocation7 + $0x10] sm:$0xff]  ;;  %v1240_v7 = vmov 0.0   ;;  %vm73_vm0 = vcmask 1040384  }
   0xe   :  { %211 = vmatpush.msra.mxu1 %v1266_v0  ;;  %s1023_s1 = sld [smem:[#allocation3 + $0x80]]  ;;  %v1274_v3 = vld [vmem:[#allocation7 + $0x8] sm:$0xff]  ;;  %v1277_v4 = vld [vmem:[#allocation7] sm:$0x1]  ;;  %v1281_v8 = vld [vmem:[#allocation7 + $0x1] sm:$0x1] }
   0xf   :  { %s1241_s20 = smov 32   ;;  %s1242_s21 = smov 96   ;;  %v1290_v23 = vld [vmem:[#allocation7 + $0x60] sm:$0xff]  ;;  %v1294_v24 = vld [vmem:[#allocation7 + $0x58] sm:$0xff]  ;;  %v1298_v25 = vld [vmem:[#allocation7 + $0x50] sm:$0xff]  ;;  %vm174_vm1 = vcmask 261120  }
  0x10   :  { %212 = vmatpush.msra.mxu1 %v1268_v1  ;;  %s1243_s22 = smov 64   ;;  %190 = vmatpush.msra.mxu0 %v1290_v23  ;;  %v1302_v26 = vld [vmem:[#allocation7 + $0x48] sm:$0xff]  ;;  %v1305_v27 = vld [vmem:[#allocation7 + $0x40] sm:$0xff]  ;;  %v1307_v28 = vld [vmem:[#allocation7 + $0x38] sm:$0xff]  ;;  %s1024_s23 = sld [smem:[#allocation3 + $0x1]]  ;;  %vm1003_vm2 = vcmask 25600  }
  0x11   :  { %290 = vmatpush.msra.mxu3 %v1290_v23  ;;  %251 = vmatpush.msra.mxu2 %v1305_v27  ;;  %v1312_v29 = vld [vmem:[#allocation7 + $0x30] sm:$0xff]  ;;  %v1318_v30 = vld [vmem:[#allocation7 + $0x28] sm:$0xff]  ;;  %s1025_s24 = sld [smem:[#allocation3 + $0x81]]  ;;  %v1357_v49 = vld [vmem:[#allocation7 + $0x2] ss:$0 sm:$0xff]  ;;  %s1244_s9 = smov [#allocation8]  }
  0x12   :  { %213 = vmatpush.msra.mxu1 %v1271_v2  ;;  %191 = vmatpush.msra.mxu0 %v1294_v24  ;;  %s1027_s25 = sld [smem:[#allocation3 + $0x82]]  ;;  %s1010_s10 = sshll.u32 %s1244_s9, 4  ;;  %s1011_s10 = int_to_ptr.vmem [resolvable:$true] %s1010_s10 }
  0x13   :  { %v63_v5 = vstv %s62_s0  ;;  %291 = vmatpush.msra.mxu3 %v1294_v24  ;;  %252 = vmatpush.msra.mxu2 %v1307_v28  ;;  %s1026_s26 = sld [smem:[#allocation3 + $0x2]]  ;;  %s1012_s13 = sshll.u32 %s1540_s2, 4  ;;  %s1013_s13 = int_to_ptr.hbm [resolvable:$true] %s1012_s13 }
  0x14   :  { %214 = vmatpush.msra.mxu1 %v1274_v3  ;;  %v64_v6 = vmul.f32 %v63_v5, %v1277_v4  ;;  %v67_v9 = vstv %s1023_s1  ;;  %192 = vmatpush.msra.mxu0 %v1298_v25  ;;  %s1029_s27 = sld [smem:[#allocation3 + $0x83]] }
  0x15   :  { %215 = vmatmul.f32.vlgmr.msra.gmra.mxu1 %v1240_v7  ;;  %v68_v10 = vmul.f32 %v67_v9, %v1277_v4  ;;  %292 = vmatpush.msra.mxu3 %v1298_v25  ;;  %s1028_s28 = sld [smem:[#allocation3 + $0x3]] }
  0x16   :  { %v65_v11 = vadd.f32 %v64_v6, %v1281_v8  ;;  %193 = vmatpush.msra.mxu0 %v1302_v26  ;;  %351 = vmatpush.msrb.mxu1 %v1305_v27  ;;  %v77_v39 = vstv %s1024_s23  ;;  %s1031_s29 = sld [smem:[#allocation3 + $0x84]] }
  0x17   :  { %v69_v12 = vadd.f32 %v68_v10, %v1281_v8  ;;  %293 = vmatpush.msra.mxu3 %v1302_v26  ;;  %194 = vmatmul.f32.vlgmr.msra.gmra.mxu0 %v1240_v7  ;;  %v81_v40 = vstv %s1025_s24  ;;  %v78_v41 = vmul.f32 %v77_v39, %v1277_v4  ;;  %s1030_s30 = sld [smem:[#allocation3 + $0x4]] }
  0x18   :  { %311 = vmatpush.msrb.mxu0 %v1266_v0  ;;  %352 = vmatpush.msrb.mxu1 %v1307_v28  ;;  %v82_v42 = vmul.f32 %v81_v40, %v1277_v4  ;;  %s1033_s3 = sld [smem:[#allocation3 + $0x85]] }
  0x19   :  { %v71_v13 = vrot.slane %v69_v12, 7  ;;  %411 = vmatpush.msrb.mxu3 %v1266_v0  ;;  %253 = vmatpush.msra.mxu2 %v1312_v29  ;;  %v79_v43 = vadd.f32 %v78_v41, %v1281_v8  ;;  %s1032_s4 = sld [smem:[#allocation3 + $0x5]] }
  0x1a   :  { %312 = vmatpush.msrb.mxu0 %v1268_v1  ;;  %353 = vmatpush.msrb.mxu1 %v1312_v29  ;;  %v83_v44 = vadd.f32 %v82_v42, %v1281_v8  ;;  %s1035_s5 = sld [smem:[#allocation3 + $0x86]] }
  0x1b   :  { %v74_v14 = vsel %vm73_vm0, %v65_v11, %v71_v13  ;;  %412 = vmatpush.msrb.mxu3 %v1268_v1  ;;  %254 = vmatpush.msra.mxu2 %v1318_v30  ;;  %s1034_s6 = sld [smem:[#allocation3 + $0x6]] }
  0x1c   :  { %75 = vst [vmem:[#allocation2] sm:$0x3] %v74_v14  ;;  %313 = vmatpush.msrb.mxu0 %v1271_v2  ;;  %354 = vmatpush.msrb.mxu1 %v1318_v30  ;;  %v85_v45 = vrot.slane %v83_v44, 7  ;;  %s1037_s7 = sld [smem:[#allocation3 + $0x87]] }
  0x1d   :  { %413 = vmatpush.msrb.mxu3 %v1271_v2  ;;  %390 = vmatpush.msrb.mxu2 %v1290_v23  ;;  %s1036_s8 = sld [smem:[#allocation3 + $0x7]] }
  0x1e   :  { %314 = vmatpush.msrb.mxu0 %v1274_v3  ;;  %490 = vmatpush.msra.mxu1 %v1290_v23  ;;  %v87_v46 = vsel %vm73_vm0, %v79_v43, %v85_v45 }
  0x1f   :  { %414 = vmatpush.msrb.mxu3 %v1274_v3  ;;  %391 = vmatpush.msrb.mxu2 %v1294_v24  ;;  %89 = vst [vmem:[#allocation2 + $0x2] sm:$0x3] %v87_v46 }
  0x20   :  { %451 = vmatpush.msra.mxu0 %v1305_v27  ;;  %491 = vmatpush.msra.mxu1 %v1294_v24 }
  0x21   :  { %392 = vmatpush.msrb.mxu2 %v1298_v25 }
  0x22   :  { %452 = vmatpush.msra.mxu0 %v1307_v28  ;;  %492 = vmatpush.msra.mxu1 %v1298_v25 }
  0x23   :  { %v198_v15 = vld [vmem:[#allocation2] sm:$0x3]  ;;  %393 = vmatpush.msrb.mxu2 %v1302_v26 }
  0x24   :  { %453 = vmatpush.msra.mxu0 %v1312_v29  ;;  %493 = vmatpush.msra.mxu1 %v1302_v26 }
  0x26   :  { %454 = vmatpush.msra.mxu0 %v1318_v30  ;;  %v298_v48 = vld [vmem:[#allocation2 + $0x2] sm:$0x3] }
  0x92   :  { %v216_v16 = vpop.f32.mrf.mxu1 }
  0x93   :  { %v219_v17 = vadd.f32 %v216_v16, %v198_v15 }
  0x94   :  { %v195_v47 = vpop.f32.mrf.mxu0 }
  0x95   :  { %v220_v18 = vmul.f32 0.5, %v219_v17  ;;  %v196_v52 = vadd.f32 %v1357_v49, %v195_v47 }
  0x97   :  { %1072 = vtanh.f32 %v220_v18 }
  0x98   :  { %1074 = vtanh.f32 %v219_v17 }
  0x9d   :  { %v1073_v19 = vpop.eup %1072 }
  0x9e   :  { %v222_v20 = vadd.f32 1.0, %v1073_v19  ;;  %v1075_v22 = vpop.eup %1074 }
  0xa0   :  { %v223_v21 = vmul.f32 0.5, %v222_v20 }
  0xa2   :  { %229 = vrot.lane.b32.xlu1 %v223_v21, %s1241_s20  ;;  %225 = vrot.lane.b32.xlu0 %v223_v21, %s1242_s21 }
  0xaa   :  { %227 = vrot.lane.b32.xlu0 %v1075_v22, %s1243_s22 }
 0x114   :  { %v226_v31 = vpop.permute.xlu0 %225  ;;  %v230_v37 = vpop.permute.xlu1 %229 }
 0x115   :  { %v231_v33 = vmul.f32 0.0, %v226_v31  ;;  %v95_v31 = vstv %s1027_s25 }
 0x11c   :  { %v228_v32 = vpop.permute.xlu0 %227 }
 0x11d   :  { %v232_v34 = vmul.f32 %v228_v32, %v223_v21  ;;  %v96_v32 = vmul.f32 %v95_v31, %v1277_v4 }
 0x11f   :  { %v233_v35 = vadd.f32 %v232_v34, %v231_v33  ;;  %v91_v33 = vstv %s1026_s26 }
 0x120   :  { %v92_v34 = vmul.f32 %v91_v33, %v1277_v4 }
 0x121   :  { %1076 = vtanh.f32 %v233_v35 }
 0x127   :  { %v1077_v36 = vpop.eup %1076 }
 0x128   :  { %v235_v38 = vmul.f32 %v1077_v36, %v230_v37  ;;  %v93_v36 = vadd.f32 %v92_v34, %v1281_v8 }
 0x12a   :  { %1038 = vmatmul.msk.f32.vlgmr.msra.gmra.mxu2 %vm174_vm1, %v235_v38  ;;  %1040 = vmatmul.msk.f32.vlgmr.msrb.gmra.mxu0 %vm174_vm1, %v235_v38 }
 0x12b   :  { %511 = vmatpush.msra.mxu2 %v1266_v0  ;;  %590 = vmatpush.msrb.mxu0 %v1290_v23 }
 0x12d   :  { %512 = vmatpush.msra.mxu2 %v1268_v1  ;;  %591 = vmatpush.msrb.mxu0 %v1294_v24 }
 0x12f   :  { %513 = vmatpush.msra.mxu2 %v1271_v2  ;;  %592 = vmatpush.msrb.mxu0 %v1298_v25 }
 0x131   :  { %514 = vmatpush.msra.mxu2 %v1274_v3  ;;  %593 = vmatpush.msrb.mxu0 %v1302_v26 }
 0x1a7   :  { %v316_v50 = vpop.f32.mrf.mxu0 }
 0x1a8   :  { %v319_v51 = vadd.f32 %v316_v50, %v298_v48 }
 0x1aa   :  { %1078 = vtanh.f32 %v319_v51  ;;  %v320_v53 = vmul.f32 0.5, %v319_v51 }
 0x1ac   :  { %1080 = vtanh.f32 %v320_v53 }
 0x1ad   :  { %v256_v54 = vpop.f32.mrf.mxu2 }
 0x1ae   :  { %v257_v55 = vadd.f32 %v256_v54, %v196_v52 }
 0x1b0   :  { %v1079_v56 = vpop.eup %1078  ;;  %v259_v57 = vmul.f32 0.5, %v257_v55  ;;  %1082 = vtanh.f32 %v257_v55 }
 0x1b1   :  { %327 = vrot.lane.b32.xlu0 %v1079_v56, %s1243_s22 }
 0x1b2   :  { %1084 = vtanh.f32 %v259_v57  ;;  %v1081_v58 = vpop.eup %1080 }
 0x1b3   :  { %v322_v62 = vadd.f32 1.0, %v1081_v58 }
 0x1b5   :  { %v323_v5 = vmul.f32 0.5, %v322_v62 }
 0x1b6   :  { %v1083_v59 = vpop.eup %1082 }
 0x1b7   :  { %266 = vrot.lane.b32.xlu2 %v1083_v59, %s1243_s22 }
 0x1b8   :  { %v1085_v60 = vpop.eup %1084 }
 0x1b9   :  { %v261_v61 = vadd.f32 1.0, %v1085_v60 }
 0x1bb   :  { %v262_v63 = vmul.f32 0.5, %v261_v61 }
 0x1bd   :  { %264 = vrot.lane.b32.xlu1 %v262_v63, %s1242_s21 }
 0x1bf   :  { %325 = vrot.lane.b32.xlu2 %v323_v5, %s1242_s21 }
 0x1c5   :  { %268 = vrot.lane.b32.xlu1 %v262_v63, %s1241_s20 }
 0x1c7   :  { %329 = vrot.lane.b32.xlu2 %v323_v5, %s1241_s20 }
 0x211   :  { %v267_v6 = vpop.permute.xlu2 %266 }
 0x212   :  { %v271_v17 = vmul.f32 %v267_v6, %v262_v63 }
 0x219   :  { %v326_v7 = vpop.permute.xlu2 %325 }
 0x21a   :  { %v331_v10 = vmul.f32 %v326_v7, %v233_v35  ;;  %v97_v35 = vadd.f32 %v96_v32, %v1281_v8 }
 0x21c   :  { %v99_v37 = vrot.slane %v97_v35, 7 }
 0x21e   :  { %v101_v38 = vsel %vm73_vm0, %v93_v36, %v99_v37 }
 0x21f   :  { %103 = vst [vmem:[#allocation2 + $0x4] sm:$0x3] %v101_v38 }
 0x221   :  { %v330_v14 = vpop.permute.xlu2 %329 }
 0x223   :  { %v328_v9 = vpop.permute.xlu0 %327 }
 0x224   :  { %v332_v11 = vmul.f32 %v328_v9, %v323_v5 }
 0x226   :  { %v1366_v12 = vadd.f32 %v332_v11, %v331_v10  ;;  %v398_v44 = vld [vmem:[#allocation2 + $0x4] sm:$0x3] }
 0x228   :  { %1086 = vtanh.f32 %v1366_v12 }
 0x22e   :  { %v1087_v13 = vpop.eup %1086 }
 0x22f   :  { %v265_v15 = vpop.permute.xlu1 %264  ;;  %v335_v16 = vmul.f32 %v1087_v13, %v330_v14 }
 0x230   :  { %v270_v18 = vmul.f32 0.0, %v265_v15 }
 0x231   :  { %1041 = vmatmul.msk.f32.vlgmr.msrb.gmra.mxu1 %vm174_vm1, %v335_v16 }
 0x232   :  { %v272_v19 = vadd.f32 %v271_v17, %v270_v18  ;;  %611 = vmatpush.msrb.mxu1 %v1266_v0  ;;  %v105_v17 = vstv %s1028_s28 }
 0x233   :  { %v106_v18 = vmul.f32 %v105_v17, %v1277_v4 }
 0x234   :  { %1088 = vtanh.f32 %v272_v19  ;;  %612 = vmatpush.msrb.mxu1 %v1268_v1 }
 0x236   :  { %613 = vmatpush.msrb.mxu1 %v1271_v2 }
 0x237   :  { %v269_v21 = vpop.permute.xlu1 %268 }
 0x238   :  { %614 = vmatpush.msrb.mxu1 %v1274_v3 }
 0x23a   :  { %v1089_v20 = vpop.eup %1088 }
 0x23b   :  { %v274_v22 = vmul.f32 %v1089_v20, %v269_v21  ;;  %v107_v20 = vadd.f32 %v106_v18, %v1281_v8 }
 0x23d   :  { %1039 = vmatmul.msk.f32.vlgmr.msra.gmra.mxu3 %vm174_vm1, %v274_v22 }
 0x23e   :  { %551 = vmatpush.msra.mxu3 %v1305_v27 }
 0x240   :  { %552 = vmatpush.msra.mxu3 %v1307_v28 }
 0x242   :  { %553 = vmatpush.msra.mxu3 %v1312_v29 }
 0x244   :  { %554 = vmatpush.msra.mxu3 %v1318_v30 }
 0x245   :  { %1043 = vmatmul.msk.f32.vlgmr.msrb.gmra.mxu3 %vm174_vm1, %v335_v16 }
 0x246   :  { %690 = vmatpush.msrb.mxu3 %v1290_v23 }
 0x248   :  { %691 = vmatpush.msrb.mxu3 %v1294_v24 }
 0x24a   :  { %692 = vmatpush.msrb.mxu3 %v1298_v25 }
 0x24c   :  { %693 = vmatpush.msrb.mxu3 %v1302_v26 }
 0x2ae   :  { %v356_v41 = vpop.f32.mrf.mxu1 }
 0x2c0   :  { %v295_v39 = vpop.f32.mrf.mxu3 }
 0x2c1   :  { %v296_v40 = vadd.f32 %v1357_v49, %v295_v39 }
 0x2c3   :  { %v357_v42 = vadd.f32 %v356_v41, %v296_v40 }
 0x2c5   :  { %v359_v43 = vmul.f32 0.5, %v357_v42  ;;  %1090 = vtanh.f32 %v357_v42 }
 0x2c7   :  { %1092 = vtanh.f32 %v359_v43 }
 0x2c8   :  { %v416_v45 = vpop.f32.mrf.mxu3 }
 0x2c9   :  { %v419_v46 = vadd.f32 %v416_v45, %v398_v44 }
 0x2cb   :  { %v1091_v47 = vpop.eup %1090  ;;  %v420_v48 = vmul.f32 0.5, %v419_v46 }
 0x2cc   :  { %366 = vrot.lane.b32.xlu1 %v1091_v47, %s1243_s22 }
 0x2cd   :  { %v1093_v50 = vpop.eup %1092  ;;  %1094 = vtanh.f32 %v420_v48 }
 0x2ce   :  { %v361_v51 = vadd.f32 1.0, %v1093_v50  ;;  %1096 = vtanh.f32 %v419_v46 }
 0x2d0   :  { %v362_v52 = vmul.f32 0.5, %v361_v51 }
 0x2d2   :  { %364 = vrot.lane.b32.xlu0 %v362_v52, %s1242_s21 }
 0x2d3   :  { %v1095_v53 = vpop.eup %1094 }
 0x2d4   :  { %368 = vrot.lane.b32.xlu1 %v362_v52, %s1241_s20  ;;  %v422_v54 = vadd.f32 1.0, %v1095_v53  ;;  %v1097_v56 = vpop.eup %1096 }
 0x2d6   :  { %v423_v55 = vmul.f32 0.5, %v422_v54 }
 0x2d8   :  { %425 = vrot.lane.b32.xlu2 %v423_v55, %s1242_s21 }
 0x2da   :  { %427 = vrot.lane.b32.xlu0 %v1097_v56, %s1243_s22 }
 0x2e0   :  { %429 = vrot.lane.b32.xlu2 %v423_v55, %s1241_s20 }
 0x332   :  { %v426_v62 = vpop.permute.xlu2 %425 }
 0x333   :  { %v431_v5 = vmul.f32 %v426_v62, %v1366_v12  ;;  %v109_v12 = vstv %s1029_s27 }
 0x334   :  { %v110_v16 = vmul.f32 %v109_v12, %v1277_v4 }
 0x33a   :  { %v430_v14 = vpop.permute.xlu2 %429 }
 0x33e   :  { %v367_v57 = vpop.permute.xlu1 %366 }
 0x33f   :  { %v371_v59 = vmul.f32 %v367_v57, %v362_v52 }
 0x344   :  { %v365_v58 = vpop.permute.xlu0 %364 }
 0x345   :  { %v370_v60 = vmul.f32 %v365_v58, %v272_v19  ;;  %v111_v19 = vadd.f32 %v110_v16, %v1281_v8 }
 0x346   :  { %v369_v9 = vpop.permute.xlu1 %368 }
 0x347   :  { %v1396_v61 = vadd.f32 %v371_v59, %v370_v60  ;;  %v113_v21 = vrot.slane %v111_v19, 7 }
 0x349   :  { %1098 = vtanh.f32 %v1396_v61  ;;  %v115_v22 = vsel %vm73_vm0, %v107_v20, %v113_v21 }
 0x34a   :  { %117 = vst [vmem:[#allocation2 + $0x6] sm:$0x3] %v115_v22 }
 0x34c   :  { %v428_v63 = vpop.permute.xlu0 %427 }
 0x34d   :  { %v432_v6 = vmul.f32 %v428_v63, %v423_v55 }
 0x34f   :  { %v1099_v7 = vpop.eup %1098  ;;  %v1400_v10 = vadd.f32 %v432_v6, %v431_v5  ;;  %v123_v6 = vstv %s1031_s29 }
 0x350   :  { %v374_v11 = vmul.f32 %v1099_v7, %v369_v9  ;;  %v124_v7 = vmul.f32 %v123_v6, %v1277_v4  ;;  %v119_v9 = vstv %s1030_s30 }
 0x351   :  { %1100 = vtanh.f32 %v1400_v10  ;;  %v498_v36 = vld [vmem:[#allocation2 + $0x6] sm:$0x3] }
 0x352   :  { %1042 = vmatmul.msk.f32.vlgmr.msrb.gmra.mxu2 %vm174_vm1, %v374_v11 }
 0x353   :  { %651 = vmatpush.msrb.mxu2 %v1305_v27 }
 0x355   :  { %652 = vmatpush.msrb.mxu2 %v1307_v28 }
 0x357   :  { %v1101_v13 = vpop.eup %1100  ;;  %653 = vmatpush.msrb.mxu2 %v1312_v29 }
 0x358   :  { %v435_v15 = vmul.f32 %v1101_v13, %v430_v14 }
 0x359   :  { %654 = vmatpush.msrb.mxu2 %v1318_v30 }
 0x35a   :  { %1044 = vmatmul.msk.f32.vlgmr.msra.gmra.mxu0 %vm174_vm1, %v435_v15  ;;  %1046 = vmatmul.msk.f32.vlgmr.msra.gmra.mxu2 %vm174_vm1, %v435_v15 }
 0x35b   :  { %711 = vmatpush.msra.mxu0 %v1266_v0  ;;  %790 = vmatpush.msra.mxu2 %v1290_v23 }
 0x35d   :  { %712 = vmatpush.msra.mxu0 %v1268_v1  ;;  %791 = vmatpush.msra.mxu2 %v1294_v24 }
 0x35f   :  { %713 = vmatpush.msra.mxu0 %v1271_v2  ;;  %792 = vmatpush.msra.mxu2 %v1298_v25 }
 0x361   :  { %714 = vmatpush.msra.mxu0 %v1274_v3  ;;  %793 = vmatpush.msra.mxu2 %v1302_v26 }
 0x3d5   :  { %v395_v31 = vpop.f32.mrf.mxu2 }
 0x3d6   :  { %v396_v32 = vadd.f32 %v1357_v49, %v395_v31 }
 0x3d7   :  { %v456_v33 = vpop.f32.mrf.mxu0 }
 0x3d8   :  { %v457_v34 = vadd.f32 %v456_v33, %v396_v32 }
 0x3da   :  { %v459_v35 = vmul.f32 0.5, %v457_v34  ;;  %1102 = vtanh.f32 %v457_v34 }
 0x3dc   :  { %1104 = vtanh.f32 %v459_v35 }
 0x3dd   :  { %v516_v37 = vpop.f32.mrf.mxu2 }
 0x3de   :  { %v519_v38 = vadd.f32 %v516_v37, %v498_v36 }
 0x3e0   :  { %v1103_v39 = vpop.eup %1102  ;;  %v520_v40 = vmul.f32 0.5, %v519_v38 }
 0x3e1   :  { %466 = vrot.lane.b32.xlu1 %v1103_v39, %s1243_s22 }
 0x3e2   :  { %v1105_v41 = vpop.eup %1104  ;;  %1106 = vtanh.f32 %v520_v40 }
 0x3e3   :  { %v461_v42 = vadd.f32 1.0, %v1105_v41  ;;  %1108 = vtanh.f32 %v519_v38 }
 0x3e5   :  { %v462_v43 = vmul.f32 0.5, %v461_v42 }
 0x3e7   :  { %464 = vrot.lane.b32.xlu0 %v462_v43, %s1242_s21 }
 0x3e8   :  { %v1107_v44 = vpop.eup %1106 }
 0x3e9   :  { %468 = vrot.lane.b32.xlu1 %v462_v43, %s1241_s20  ;;  %v522_v45 = vadd.f32 1.0, %v1107_v44  ;;  %v1109_v47 = vpop.eup %1108 }
 0x3eb   :  { %v523_v46 = vmul.f32 0.5, %v522_v45 }
 0x3ed   :  { %525 = vrot.lane.b32.xlu2 %v523_v46, %s1242_s21 }
 0x3ef   :  { %527 = vrot.lane.b32.xlu0 %v1109_v47, %s1243_s22 }
 0x3f5   :  { %529 = vrot.lane.b32.xlu2 %v523_v46, %s1241_s20 }
 0x447   :  { %v526_v54 = vpop.permute.xlu2 %525 }
 0x448   :  { %v531_v56 = vmul.f32 %v526_v54, %v1400_v10  ;;  %v125_v10 = vadd.f32 %v124_v7, %v1281_v8 }
 0x44a   :  { %v127_v11 = vrot.slane %v125_v10, 7 }
 0x44f   :  { %v530_v63 = vpop.permute.xlu2 %529 }
 0x453   :  { %v467_v48 = vpop.permute.xlu1 %466 }
 0x454   :  { %v471_v51 = vmul.f32 %v467_v48, %v462_v43 }
 0x459   :  { %v465_v50 = vpop.permute.xlu0 %464 }
 0x45a   :  { %v470_v52 = vmul.f32 %v465_v50, %v1396_v61 }
 0x45b   :  { %v469_v59 = vpop.permute.xlu1 %468 }
 0x45c   :  { %v1431_v53 = vadd.f32 %v471_v51, %v470_v52 }
 0x45e   :  { %1110 = vtanh.f32 %v1431_v53 }
 0x461   :  { %v528_v55 = vpop.permute.xlu0 %527 }
 0x462   :  { %v532_v57 = vmul.f32 %v528_v55, %v523_v46 }
 0x464   :  { %v1111_v58 = vpop.eup %1110  ;;  %v533_v60 = vadd.f32 %v532_v57, %v531_v56 }
 0x465   :  { %v474_v62 = vmul.f32 %v1111_v58, %v469_v59 }
 0x466   :  { %1112 = vtanh.f32 %v533_v60 }
 0x467   :  { %1045 = vmatmul.msk.f32.vlgmr.msra.gmra.mxu1 %vm174_vm1, %v474_v62 }
 0x468   :  { %751 = vmatpush.msra.mxu1 %v1305_v27 }
 0x46a   :  { %752 = vmatpush.msra.mxu1 %v1307_v28 }
 0x46c   :  { %v1113_v61 = vpop.eup %1112  ;;  %753 = vmatpush.msra.mxu1 %v1312_v29 }
 0x46d   :  { %v535_v5 = vmul.f32 %v1113_v61, %v530_v63 }
 0x46e   :  { %754 = vmatpush.msra.mxu1 %v1318_v30 }
 0x46f   :  { %1047 = vmatmul.msk.f32.vlgmr.msra.gmra.mxu3 %vm174_vm1, %v535_v5  ;;  %1049 = vmatmul.msk.f32.vlgmr.msrb.gmra.mxu1 %vm174_vm1, %v535_v5 }
 0x470   :  { %811 = vmatpush.msra.mxu3 %v1266_v0  ;;  %890 = vmatpush.msrb.mxu1 %v1290_v23  ;;  %v120_v23 = vmul.f32 %v119_v9, %v1277_v4 }
 0x472   :  { %812 = vmatpush.msra.mxu3 %v1268_v1  ;;  %891 = vmatpush.msrb.mxu1 %v1294_v24  ;;  %v121_v24 = vadd.f32 %v120_v23, %v1281_v8 }
 0x474   :  { %813 = vmatpush.msra.mxu3 %v1271_v2  ;;  %892 = vmatpush.msrb.mxu1 %v1298_v25  ;;  %v129_v13 = vsel %vm73_vm0, %v121_v24, %v127_v11 }
 0x475   :  { %131 = vst [vmem:[#allocation2 + $0x8] sm:$0x3] %v129_v13 }
 0x476   :  { %814 = vmatpush.msra.mxu3 %v1274_v3  ;;  %893 = vmatpush.msrb.mxu1 %v1302_v26 }
 0x47c   :  { %v598_v14 = vld [vmem:[#allocation2 + $0x8] sm:$0x3] }
 0x4e4   :  { %v495_v25 = vpop.f32.mrf.mxu1 }
 0x4e5   :  { %v496_v16 = vadd.f32 %v1357_v49, %v495_v25 }
 0x4ec   :  { %v616_v15 = vpop.f32.mrf.mxu1 }
 0x4ed   :  { %v619_v26 = vadd.f32 %v616_v15, %v598_v14 }
 0x4ef   :  { %v620_v12 = vmul.f32 0.5, %v619_v26  ;;  %1114 = vtanh.f32 %v619_v26 }
 0x4f1   :  { %1116 = vtanh.f32 %v620_v12 }
 0x4f2   :  { %v556_v17 = vpop.f32.mrf.mxu3 }
 0x4f3   :  { %v557_v18 = vadd.f32 %v556_v17, %v496_v16 }
 0x4f5   :  { %v1115_v19 = vpop.eup %1114  ;;  %v559_v20 = vmul.f32 0.5, %v557_v18 }
 0x4f6   :  { %627 = vrot.lane.b32.xlu1 %v1115_v19, %s1243_s22 }
 0x4f7   :  { %v1117_v21 = vpop.eup %1116  ;;  %1118 = vtanh.f32 %v559_v20 }
 0x4f8   :  { %v622_v22 = vadd.f32 1.0, %v1117_v21  ;;  %1120 = vtanh.f32 %v557_v18 }
 0x4fa   :  { %v623_v31 = vmul.f32 0.5, %v622_v22 }
 0x4fc   :  { %625 = vrot.lane.b32.xlu0 %v623_v31, %s1242_s21 }
 0x4fd   :  { %v1119_v32 = vpop.eup %1118 }
 0x4fe   :  { %629 = vrot.lane.b32.xlu1 %v623_v31, %s1241_s20  ;;  %v561_v33 = vadd.f32 1.0, %v1119_v32  ;;  %v1121_v35 = vpop.eup %1120 }
 0x500   :  { %v562_v34 = vmul.f32 0.5, %v561_v33 }
 0x502   :  { %564 = vrot.lane.b32.xlu2 %v562_v34, %s1242_s21 }
 0x504   :  { %566 = vrot.lane.b32.xlu0 %v1121_v35, %s1243_s22 }
 0x50a   :  { %568 = vrot.lane.b32.xlu2 %v562_v34, %s1241_s20 }
 0x55c   :  { %v565_v41 = vpop.permute.xlu2 %564 }
 0x55d   :  { %v570_v43 = vmul.f32 %v565_v41, %v1431_v53 }
 0x564   :  { %v569_v51 = vpop.permute.xlu2 %568 }
 0x568   :  { %v628_v36 = vpop.permute.xlu1 %627 }
 0x569   :  { %v632_v38 = vmul.f32 %v628_v36, %v623_v31  ;;  %v151_v36 = vstv %s1035_s5 }
 0x56e   :  { %v626_v37 = vpop.permute.xlu0 %625 }
 0x56f   :  { %v631_v39 = vmul.f32 %v626_v37, %v533_v60  ;;  %v152_v37 = vmul.f32 %v151_v36, %v1277_v4 }
 0x570   :  { %v630_v46 = vpop.permute.xlu1 %629 }
 0x571   :  { %v1462_v40 = vadd.f32 %v632_v38, %v631_v39  ;;  %v147_v38 = vstv %s1034_s6 }
 0x573   :  { %1122 = vtanh.f32 %v1462_v40 }
 0x576   :  { %v567_v42 = vpop.permute.xlu0 %566 }
 0x577   :  { %v571_v44 = vmul.f32 %v567_v42, %v562_v34 }
 0x579   :  { %v1123_v45 = vpop.eup %1122  ;;  %v572_v47 = vadd.f32 %v571_v44, %v570_v43 }
 0x57a   :  { %v635_v48 = vmul.f32 %v1123_v45, %v630_v46 }
 0x57b   :  { %1124 = vtanh.f32 %v572_v47 }
 0x57c   :  { %1050 = vmatmul.msk.f32.vlgmr.msrb.gmra.mxu2 %vm174_vm1, %v635_v48 }
 0x57d   :  { %911 = vmatpush.msrb.mxu2 %v1266_v0  ;;  %v137_v0 = vstv %s1033_s3 }
 0x57f   :  { %912 = vmatpush.msrb.mxu2 %v1268_v1  ;;  %v138_v1 = vmul.f32 %v137_v0, %v1277_v4 }
 0x581   :  { %v1125_v50 = vpop.eup %1124  ;;  %913 = vmatpush.msrb.mxu2 %v1271_v2  ;;  %v133_v2 = vstv %s1032_s4  ;;  %v139_v53 = vadd.f32 %v138_v1, %v1281_v8 }
 0x582   :  { %v574_v52 = vmul.f32 %v1125_v50, %v569_v51 }
 0x583   :  { %914 = vmatpush.msrb.mxu2 %v1274_v3  ;;  %v134_v3 = vmul.f32 %v133_v2, %v1277_v4  ;;  %v141_v55 = vrot.slane %v139_v53, 7 }
 0x584   :  { %1048 = vmatmul.msk.f32.vlgmr.msrb.gmra.mxu0 %vm174_vm1, %v574_v52 }
 0x585   :  { %851 = vmatpush.msrb.mxu0 %v1305_v27  ;;  %v135_v54 = vadd.f32 %v134_v3, %v1281_v8 }
 0x587   :  { %852 = vmatpush.msrb.mxu0 %v1307_v28  ;;  %v143_v56 = vsel %vm73_vm0, %v135_v54, %v141_v55 }
 0x588   :  { %145 = vst [vmem:[#allocation2 + $0xa] sm:$0x3] %v143_v56 }
 0x589   :  { %853 = vmatpush.msrb.mxu0 %v1312_v29 }
 0x58b   :  { %854 = vmatpush.msrb.mxu0 %v1318_v30 }
 0x58c   :  { %1052 = vmatmul.msk.f32.vlgmr.msra.gmra.mxu0 %vm174_vm1, %v635_v48 }
 0x58f   :  { %v698_v61 = vld [vmem:[#allocation2 + $0xa] sm:$0x3] }
 0x5ff   :  { %v656_v59 = vpop.f32.mrf.mxu2 }
 0x601   :  { %v595_v57 = vpop.f32.mrf.mxu0 }
 0x602   :  { %v596_v58 = vadd.f32 %v1357_v49, %v595_v57 }
 0x604   :  { %v657_v60 = vadd.f32 %v656_v59, %v596_v58 }
 0x606   :  { %v659_v62 = vmul.f32 0.5, %v657_v60  ;;  %1126 = vtanh.f32 %v657_v60 }
 0x608   :  { %1128 = vtanh.f32 %v659_v62 }
 0x609   :  { %v716_v63 = vpop.f32.mrf.mxu0 }
 0x60a   :  { %v719_v5 = vadd.f32 %v716_v63, %v698_v61 }
 0x60c   :  { %v1127_v6 = vpop.eup %1126  ;;  %v720_v7 = vmul.f32 0.5, %v719_v5 }
 0x60d   :  { %666 = vrot.lane.b32.xlu1 %v1127_v6, %s1243_s22 }
 0x60e   :  { %v1129_v9 = vpop.eup %1128  ;;  %1130 = vtanh.f32 %v720_v7 }
 0x60f   :  { %v661_v23 = vadd.f32 1.0, %v1129_v9  ;;  %1132 = vtanh.f32 %v719_v5 }
 0x611   :  { %v662_v10 = vmul.f32 0.5, %v661_v23 }
 0x613   :  { %664 = vrot.lane.b32.xlu0 %v662_v10, %s1242_s21 }
 0x614   :  { %v1131_v24 = vpop.eup %1130 }
 0x615   :  { %668 = vrot.lane.b32.xlu1 %v662_v10, %s1241_s20  ;;  %v722_v11 = vadd.f32 1.0, %v1131_v24  ;;  %v1133_v25 = vpop.eup %1132  ;;  %v165_v24 = vstv %s1037_s7 }
 0x617   :  { %v723_v13 = vmul.f32 0.5, %v722_v11  ;;  %v166_v11 = vmul.f32 %v165_v24, %v1277_v4 }
 0x619   :  { %725 = vrot.lane.b32.xlu2 %v723_v13, %s1242_s21 }
 0x61b   :  { %727 = vrot.lane.b32.xlu0 %v1133_v25, %s1243_s22 }
 0x621   :  { %729 = vrot.lane.b32.xlu2 %v723_v13, %s1241_s20 }
 0x673   :  { %v726_v17 = vpop.permute.xlu2 %725 }
 0x674   :  { %v731_v19 = vmul.f32 %v726_v17, %v1462_v40 }
 0x67b   :  { %v730_v34 = vpop.permute.xlu2 %729 }
 0x67f   :  { %v667_v14 = vpop.permute.xlu1 %666 }
 0x680   :  { %v671_v26 = vmul.f32 %v667_v14, %v662_v10  ;;  %v167_v14 = vadd.f32 %v166_v11, %v1281_v8 }
 0x685   :  { %v665_v15 = vpop.permute.xlu0 %664 }
 0x686   :  { %v670_v12 = vmul.f32 %v665_v15, %v572_v47 }
 0x687   :  { %v669_v22 = vpop.permute.xlu1 %668 }
 0x688   :  { %v672_v16 = vadd.f32 %v671_v26, %v670_v12  ;;  %v169_v26 = vrot.slane %v167_v14, 7 }
 0x68a   :  { %1134 = vtanh.f32 %v672_v16 }
 0x68d   :  { %v728_v18 = vpop.permute.xlu0 %727 }
 0x68e   :  { %v732_v20 = vmul.f32 %v728_v18, %v723_v13  ;;  %v161_v13 = vstv %s1036_s8 }
 0x68f   :  { %v162_v25 = vmul.f32 %v161_v13, %v1277_v4 }
 0x690   :  { %v1135_v21 = vpop.eup %1134  ;;  %v733_v31 = vadd.f32 %v732_v20, %v731_v19 }
 0x691   :  { %v674_v32 = vmul.f32 %v1135_v21, %v669_v22  ;;  %v163_v15 = vadd.f32 %v162_v25, %v1281_v8 }
 0x692   :  { %1136 = vtanh.f32 %v733_v31 }
 0x693   :  { %1051 = vmatmul.msk.f32.vlgmr.msrb.gmra.mxu3 %vm174_vm1, %v674_v32  ;;  %v171_v12 = vsel %vm73_vm0, %v163_v15, %v169_v26 }
 0x694   :  { %951 = vmatpush.msrb.mxu3 %v1305_v27  ;;  %v148_v27 = vmul.f32 %v147_v38, %v1277_v4  ;;  %173 = vst [vmem:[#allocation2 + $0xe] sm:$0x3] %v171_v12 }
 0x696   :  { %952 = vmatpush.msrb.mxu3 %v1307_v28  ;;  %v153_v28 = vadd.f32 %v152_v37, %v1281_v8  ;;  %v149_v39 = vadd.f32 %v148_v27, %v1281_v8 }
 0x698   :  { %v1137_v33 = vpop.eup %1136  ;;  %953 = vmatpush.msrb.mxu3 %v1312_v29  ;;  %v155_v29 = vrot.slane %v153_v28, 7 }
 0x699   :  { %v735_v35 = vmul.f32 %v1137_v33, %v730_v34 }
 0x69a   :  { %954 = vmatpush.msrb.mxu3 %v1318_v30  ;;  %v157_v40 = vsel %vm73_vm0, %v149_v39, %v155_v29 }
 0x69b   :  { %1053 = vmatmul.msk.f32.vlgmr.msra.gmra.mxu1 %vm174_vm1, %v735_v35  ;;  %1055 = vmatmul.msk.f32.vlgmr.msra.gmra.mxu3 %vm174_vm1, %v735_v35  ;;  %159 = vst [vmem:[#allocation2 + $0xc] sm:$0x3] %v157_v40  ;;  %v898_v21 = vld [vmem:[#allocation2 + $0xe] sm:$0x3] }
 0x6a2   :  { %v798_v45 = vld [vmem:[#allocation2 + $0xc] sm:$0x3] }
 0x716   :  { %v695_v30 = vpop.f32.mrf.mxu3 }
 0x717   :  { %v696_v41 = vadd.f32 %v1357_v49, %v695_v30 }
 0x718   :  { %v756_v42 = vpop.f32.mrf.mxu1 }
 0x719   :  { %v757_v43 = vadd.f32 %v756_v42, %v696_v41 }
 0x71b   :  { %v759_v44 = vmul.f32 0.5, %v757_v43  ;;  %1138 = vtanh.f32 %v757_v43 }
 0x71d   :  { %1140 = vtanh.f32 %v759_v44 }
 0x71e   :  { %v816_v46 = vpop.f32.mrf.mxu3 }
 0x71f   :  { %v819_v47 = vadd.f32 %v816_v46, %v798_v45 }
 0x721   :  { %v1139_v48 = vpop.eup %1138  ;;  %v820_v50 = vmul.f32 0.5, %v819_v47 }
 0x722   :  { %766 = vrot.lane.b32.xlu1 %v1139_v48, %s1243_s22 }
 0x723   :  { %v1141_v51 = vpop.eup %1140  ;;  %1142 = vtanh.f32 %v820_v50 }
 0x724   :  { %v761_v52 = vadd.f32 1.0, %v1141_v51  ;;  %1144 = vtanh.f32 %v819_v47 }
 0x726   :  { %v762_v0 = vmul.f32 0.5, %v761_v52 }
 0x728   :  { %764 = vrot.lane.b32.xlu0 %v762_v0, %s1242_s21 }
 0x729   :  { %v1143_v1 = vpop.eup %1142 }
 0x72a   :  { %768 = vrot.lane.b32.xlu1 %v762_v0, %s1241_s20  ;;  %v822_v2 = vadd.f32 1.0, %v1143_v1  ;;  %v1145_v53 = vpop.eup %1144 }
 0x72c   :  { %v823_v3 = vmul.f32 0.5, %v822_v2 }
 0x72e   :  { %825 = vrot.lane.b32.xlu2 %v823_v3, %s1242_s21 }
 0x730   :  { %827 = vrot.lane.b32.xlu0 %v1145_v53, %s1243_s22 }
 0x736   :  { %829 = vrot.lane.b32.xlu2 %v823_v3, %s1241_s20 }
 0x788   :  { %v826_v59 = vpop.permute.xlu2 %825 }
 0x789   :  { %v831_v62 = vmul.f32 %v826_v59, %v733_v31  ;;  %v57_v59 = vld [vmem:[#allocation7 + $0x68] sm:$0xff] }
 0x790   :  { %v830_v23 = vpop.permute.xlu2 %829 }
 0x794   :  { %v767_v54 = vpop.permute.xlu1 %766 }
 0x795   :  { %v771_v56 = vmul.f32 %v767_v54, %v762_v0 }
 0x79a   :  { %v765_v55 = vpop.permute.xlu0 %764 }
 0x79b   :  { %v770_v57 = vmul.f32 %v765_v55, %v672_v16 }
 0x79c   :  { %v769_v5 = vpop.permute.xlu1 %768 }
 0x79d   :  { %v1509_v58 = vadd.f32 %v771_v56, %v770_v57  ;;  %v60_v57 = vld [vmem:[#allocation7 + $0x80] sm:$0xff] }
 0x79e   :  { %991 = vmatpush.msra.mxu0 %v60_v57 }
 0x79f   :  { %1146 = vtanh.f32 %v1509_v58 }
 0x7a2   :  { %v828_v60 = vpop.permute.xlu0 %827 }
 0x7a3   :  { %v832_v61 = vmul.f32 %v828_v60, %v823_v3 }
 0x7a5   :  { %v1147_v63 = vpop.eup %1146  ;;  %v833_v6 = vadd.f32 %v832_v61, %v831_v62 }
 0x7a6   :  { %v774_v7 = vmul.f32 %v1147_v63, %v769_v5 }
 0x7a7   :  { %1148 = vtanh.f32 %v833_v6 }
 0x7a8   :  { %1054 = vmatmul.msk.f32.vlgmr.msra.gmra.mxu2 %vm174_vm1, %v774_v7 }
 0x7ad   :  { %v1149_v9 = vpop.eup %1148 }
 0x7ae   :  { %v835_v10 = vmul.f32 %v1149_v9, %v830_v23  ;;  %v1071_v23 = vld [vmem:[#allocation7 + $0x3] ss:$0 sm:$0xff] }
 0x7b0   :  { %1056 = vmatmul.msk.f32.vlgmr.msrb.gmra.mxu0 %vm174_vm1, %v835_v10  ;;  %1058 = vmatmul.msk.f32.vlgmr.msrb.gmra.mxu2 %vm174_vm1, %v835_v10 }
 0x82b   :  { %v795_v16 = vpop.f32.mrf.mxu2 }
 0x82c   :  { %v796_v17 = vadd.f32 %v1357_v49, %v795_v16 }
 0x82d   :  { %v856_v18 = vpop.f32.mrf.mxu0 }
 0x82e   :  { %v857_v19 = vadd.f32 %v856_v18, %v796_v17 }
 0x830   :  { %v859_v20 = vmul.f32 0.5, %v857_v19 }
 0x832   :  { %1150 = vtanh.f32 %v859_v20 }
 0x833   :  { %v916_v22 = vpop.f32.mrf.mxu2 }
 0x834   :  { %v919_v31 = vadd.f32 %v916_v22, %v898_v21 }
 0x836   :  { %v920_v32 = vmul.f32 0.5, %v919_v31  ;;  %1152 = vtanh.f32 %v919_v31 }
 0x838   :  { %v1151_v4 = vpop.eup %1150  ;;  %1154 = vtanh.f32 %v920_v32 }
 0x839   :  { %v861_v33 = vadd.f32 1.0, %v1151_v4  ;;  %1156 = vtanh.f32 %v857_v19 }
 0x83b   :  { %v862_v8 = vmul.f32 0.5, %v861_v33 }
 0x83c   :  { %v1153_v34 = vpop.eup %1152 }
 0x83d   :  { %927 = vrot.lane.b32.xlu1 %v1153_v34, %s1243_s22  ;;  %864 = vrot.lane.b32.xlu2 %v862_v8, %s1242_s21 }
 0x83e   :  { %v1155_v35 = vpop.eup %1154 }
 0x83f   :  { %v922_v36 = vadd.f32 1.0, %v1155_v35  ;;  %v1157_v38 = vpop.eup %1156 }
 0x841   :  { %v923_v37 = vmul.f32 0.5, %v922_v36 }
 0x843   :  { %925 = vrot.lane.b32.xlu0 %v923_v37, %s1242_s21 }
 0x845   :  { %929 = vrot.lane.b32.xlu1 %v923_v37, %s1241_s20  ;;  %868 = vrot.lane.b32.xlu2 %v862_v8, %s1241_s20 }
 0x84b   :  { %866 = vrot.lane.b32.xlu0 %v1157_v38, %s1243_s22 }
 0x897   :  { %v865_v30 = vpop.permute.xlu2 %864 }
 0x898   :  { %v870_v42 = vmul.f32 %v865_v30, %v1509_v58  ;;  %v59_v58 = vld [vmem:[#allocation7 + $0x78] sm:$0xff] }
 0x899   :  { %992 = vmatpush.msra.mxu0 %v59_v58 }
 0x89f   :  { %v869_v50 = vpop.permute.xlu2 %868 }
 0x8af   :  { %v928_v27 = vpop.permute.xlu1 %927 }
 0x8b0   :  { %v932_v39 = vmul.f32 %v928_v27, %v923_v37 }
 0x8b5   :  { %v926_v28 = vpop.permute.xlu0 %925 }
 0x8b6   :  { %v931_v29 = vmul.f32 %v926_v28, %v833_v6 }
 0x8b7   :  { %v930_v45 = vpop.permute.xlu1 %929 }
 0x8b8   :  { %v933_v40 = vadd.f32 %v932_v39, %v931_v29 }
 0x8ba   :  { %1158 = vtanh.f32 %v933_v40 }
 0x8bd   :  { %v867_v41 = vpop.permute.xlu0 %866 }
 0x8be   :  { %v871_v43 = vmul.f32 %v867_v41, %v862_v8 }
 0x8c0   :  { %v1159_v44 = vpop.eup %1158  ;;  %v872_v46 = vadd.f32 %v871_v43, %v870_v42 }
 0x8c1   :  { %v935_v47 = vmul.f32 %v1159_v44, %v930_v45 }
 0x8c2   :  { %1160 = vtanh.f32 %v872_v46 }
 0x8c3   :  { %1059 = vmatmul.msk.f32.vlgmr.msrb.gmra.mxu3 %vm174_vm1, %v935_v47 }
 0x8c8   :  { %v1161_v48 = vpop.eup %1160 }
 0x8c9   :  { %v874_v51 = vmul.f32 %v1161_v48, %v869_v50 }
 0x8cb   :  { %1057 = vmatmul.msk.f32.vlgmr.msrb.gmra.mxu1 %vm174_vm1, %v874_v51 }
 0x946   :  { %v956_v1 = vpop.f32.mrf.mxu3 }
 0x948   :  { %v895_v52 = vpop.f32.mrf.mxu1 }
 0x949   :  { %v896_v0 = vadd.f32 %v1357_v49, %v895_v52  ;;  %v58_v49 = vld [vmem:[#allocation7 + $0x70] sm:$0xff] }
 0x94a   :  { %993 = vmatpush.msra.mxu0 %v58_v49 }
 0x94b   :  { %v957_v2 = vadd.f32 %v956_v1, %v896_v0 }
 0x94c   :  { %994 = vmatpush.msra.mxu0 %v57_v59 }
 0x94d   :  { %v959_v3 = vmul.f32 0.5, %v957_v2  ;;  %1162 = vtanh.f32 %v957_v2 }
 0x94f   :  { %1164 = vtanh.f32 %v959_v3 }
 0x953   :  { %v1163_v53 = vpop.eup %1162 }
 0x954   :  { %966 = vrot.lane.b32.xlu1 %v1163_v53, %s1243_s22 }
 0x955   :  { %v1165_v54 = vpop.eup %1164 }
 0x956   :  { %v961_v55 = vadd.f32 1.0, %v1165_v54 }
 0x958   :  { %v962_v56 = vmul.f32 0.5, %v961_v55 }
 0x95a   :  { %968 = vrot.lane.b32.xlu2 %v962_v56, %s1241_s20  ;;  %964 = vrot.lane.b32.xlu0 %v962_v56, %s1242_s21 }
 0x9b4   :  { %v969_v7 = vpop.permute.xlu2 %968 }
 0x9c6   :  { %v967_v60 = vpop.permute.xlu1 %966 }
 0x9c7   :  { %v971_v61 = vmul.f32 %v967_v60, %v962_v56 }
 0x9cc   :  { %v965_v62 = vpop.permute.xlu0 %964 }
 0x9cd   :  { %v970_v63 = vmul.f32 %v965_v62, %v872_v46 }
 0x9cf   :  { %v972_v5 = vadd.f32 %v971_v61, %v970_v63 }
 0x9d1   :  { %1166 = vtanh.f32 %v972_v5 }
 0x9d7   :  { %v1167_v6 = vpop.eup %1166 }
 0x9d8   :  { %v974_v9 = vmul.f32 %v1167_v6, %v969_v7 }
 0x9da   :  { %1060 = vmatmul.msk.f32.vlgmr.msra.gmra.mxu0 %vm174_vm1, %v974_v9 }
 0xa57   :  { %v996_v10 = vpop.f32.mrf.mxu0 }
 0xa58   :  { %v997_v24 = vadd.f32 %v1071_v23, %v996_v10 }
 0xa5a   :  { %v999_v11 = vmul.f32 0.5, %v997_v24 }
 0xa5c   :  { %1168 = vtanh.f32 %v999_v11 }
 0xa62   :  { %v1169_v13 = vpop.eup %1168 }
 0xa63   :  { %v1001_v25 = vadd.f32 1.0, %v1169_v13 }
 0xa65   :  { %v1002_v14 = vmul.f32 0.5, %v1001_v25 }
 0xa67   :  { %1004 = vst.msk [vmem:[#allocation8] sm:$0x3] %vm1003_vm2, %v1002_v14 }
 0xa68   :  { %1015 = dma.vmem_to_hbm [thread:$0]  %s1011_s10, 32, %s1013_s13, [#allocation5]  }
 0xa69   :  { %1234 = dma.done.wait [#allocation5], 32  }
 0xa6a   :  { %1235 = vsyncadd [#allocation5], 4294967264 }
 0xa6b   :  { %1020 = vsyncpa [#allocation4], 1 }
 0xa6c   :  { %1021 = vsyncpa [#allocation5], 1 }
 0xa6d   :  { %1022 = vsyncpa [#allocation6], 1 }

</bundles_post_ra>
